<compile_context>
chip_gen: v5e
topology: v5e:2x2
jax: 0.10.0
libtpu: 0.0.40
codegen_flags: <defaults>
</compile_context>

<pallas_src>
import math

import jax
import jax.numpy as jnp
from jax.experimental import pallas as pl
from jax.experimental.pallas import tpu as pltpu


# ------------------------------ slab layout --------------------------------- #
def _pad8(n):
    return -(-n // 8) * 8


def slab_layout(F, H, A):
    """Static row offsets of every parameter block inside the packed slab."""
    lay = {}
    off = 0
    lay["w_ih"] = off;   off += _pad8(F)         # (F, 4H)  gate order i|f|o|g
    lay["w_hh"] = off;   off += _pad8(H)         # (H, 4H)
    lay["bias"] = off;   off += 8                # 8 rows of 1-row vectors (see pack)
    lay["w1g"] = off;    off += _pad8(H)         # (H, 3H)  [w1 | wg_feat]
    lay["w2w3"] = off;   off += _pad8(2 * H)     # (2H, 4H) [w2 | w3]
    lay["wheadT"] = off; off += _pad8(4 * A)     # (4A, 3H) transposed block-diag heads
    lay["rows"] = off
    return lay


# ----------------------------- Pallas kernel -------------------------------- #
def make_kernel(B, T, F, H, A, lay):
    LOGSQRT2PI = 0.5 * math.log(2.0 * math.pi)
    SROWS = T * B
    f32 = jnp.float32

    def kernel(inp_ref, w_ref, out_ref):
        # ---- weights (slab is VMEM-resident across the whole grid) ----
        w_ih = w_ref[lay["w_ih"]:lay["w_ih"] + F, :]                  # (F, 4H)
        w_hh = w_ref[lay["w_hh"]:lay["w_hh"] + H, :]                  # (H, 4H)
        rb = lay["bias"]
        b_lstm = w_ref[rb:rb + 1, :]                                  # (1, 4H)
        b1bg = w_ref[rb + 1:rb + 2, 0:3 * H]                          # (1, 3H) [b1|bg]
        b2 = w_ref[rb + 2:rb + 3, 0:2 * H]                            # (1, 2H)
        b3 = w_ref[rb + 2:rb + 3, 2 * H:4 * H]                        # (1, 2H)
        wg_act = w_ref[rb + 3:rb + 4, 0:H]                            # (1, H)
        bhead = w_ref[rb + 4:rb + 5, 0:4 * A]                         # (1, 4A)
        w1g = w_ref[lay["w1g"]:lay["w1g"] + H, 0:3 * H]               # (H, 3H)
        w2 = w_ref[lay["w2w3"]:lay["w2w3"] + 2 * H, 0:2 * H]          # (2H, 2H)
        w3 = w_ref[lay["w2w3"]:lay["w2w3"] + 2 * H, 2 * H:4 * H]      # (2H, 2H)
        wheadT = w_ref[lay["wheadT"]:lay["wheadT"] + 4 * A, 0:3 * H]  # (4A, 3H)

        # ---- single packed per-tile input (one DMA): states | old_action | z ----
        inp = inp_ref[0]                                              # (24, 3)
        s = inp[0:SROWS, 0:F]                                         # (T*B, F) time-major
        old_a = inp[SROWS:SROWS + B, 0:A]                             # (B, A)
        z_a = inp[SROWS + B:SROWS + B + 1, 0:1]                       # (1, 1)
        z_g = inp[SROWS + B:SROWS + B + 1, 1:2]                       # (1, 1)

        # ---- hoisted LSTM input projection (bias folded), one MXU call ----
        x_proj = jnp.dot(s, w_ih, preferred_element_type=f32) + b_lstm  # (T*B, 4H)

        # ---- fully unrolled LSTM recurrence (serial dependency chain) ----
        # TODO(synk): holding w_hh stationary via pltpu.matmul_push_rhs /
        # matmul_acc_lhs would shave the RHS re-push latency off the serial
        # chain, but the raw MXU API is not portable across v5e/v6e/v7x; kept
        # as jnp.dot for robustness.
        h = jnp.zeros((B, H), f32)
        c = jnp.zeros((B, H), f32)
        for t in range(T):
            gates = x_proj[t * B:(t + 1) * B, :] + jnp.dot(
                h, w_hh, preferred_element_type=f32)                  # (B, 4H)
            sig = jax.nn.sigmoid(gates[:, :3 * H])                    # i | f | o
            g = jnp.tanh(gates[:, 3 * H:])
            c = sig[:, H:2 * H] * c + sig[:, :H] * g
            h = sig[:, 2 * H:3 * H] * jnp.tanh(c)

        feat = h                                                      # (B, H)

        # ---- fused feat @ [w1 | wg_feat]: ActionModule + GlucoseModel start ----
        fw = jnp.dot(feat, w1g, preferred_element_type=f32) + b1bg    # (B, 3H)
        x1 = jnp.maximum(fw[:, 0:2 * H], 0.0)                         # (B, 2H)
        # old_action @ wg_act is a K=1 rank-1 product -> VPU broadcast multiply
        g1 = jnp.maximum(fw[:, 2 * H:3 * H] + old_a * wg_act, 0.0)    # (B, H)

        x2 = jnp.maximum(jnp.dot(x1, w2, preferred_element_type=f32) + b2, 0.0)
        x3 = jnp.maximum(jnp.dot(x2, w3, preferred_element_type=f32) + b3, 0.0)

        # ---- one block-diagonal head matmul: [x3 | g1] @ [w_head (+) wc_head] ----
        xg = jnp.concatenate([x3, g1], axis=1)                        # (B, 3H)
        head = jax.lax.dot_general(
            xg, wheadT, (((1,), (1,)), ((), ())),
            preferred_element_type=f32) + bhead                       # (B, 4A)

        mu = jnp.tanh(head[:, 0:A])
        sigma = jax.nn.sigmoid(head[:, A:2 * A] + 1e-5)
        cgm_mu = jnp.tanh(head[:, 2 * A:3 * A])
        cgm_sigma = jax.nn.softplus(head[:, 3 * A:4 * A] + 1e-5)

        action = jnp.clip(mu + sigma * z_a, -1.0, 1.0)
        cgm = jnp.clip(cgm_mu + cgm_sigma * z_g, -1.0, 1.0)

        # log_prob = Normal(mu, sigma).log_prob(action[0]) (row-0 broadcast)
        a0 = action[0:1, :]
        inv_sigma = pl.reciprocal(sigma)                              # exact, EUP
        d = (a0 - mu) * inv_sigma
        log_prob = -0.5 * d * d - jnp.log(sigma) - LOGSQRT2PI

        # ---- single concatenated store -> one small writeback DMA per step ----
        packed = jnp.concatenate(
            [mu, sigma, action, log_prob, cgm_mu, cgm_sigma, cgm,
             jnp.zeros((B, A), f32)], axis=1)                         # (B, 8A)
        out_ref[0] = packed

    return kernel


# ------------------------ wrapper-side weight packing ----------------------- #
def pack_for_kernel(params, F, H, A):
    """Reorder LSTM gates to (i,f,o,g), fuse paired matrices, and lane-pack
    everything into one (152, 128) f32 slab with static 8-row-aligned offsets."""
    lay = slab_layout(F, H, A)

    def reorder(w):  # LSTM gate columns i,f,g,o -> i,f,o,g along the 4H axis
        return jnp.concatenate(
            [w[..., :2 * H], w[..., 3 * H:], w[..., 2 * H:3 * H]], axis=-1)

    slab = jnp.zeros((lay["rows"], 128), jnp.float32)

    def put(sl, arr, r0, c0):
        r, c = arr.shape
        return sl.at[r0:r0 + r, c0:c0 + c].set(arr.astype(jnp.float32))

    slab = put(slab, reorder(params["w_ih"]), lay["w_ih"], 0)
    slab = put(slab, reorder(params["w_hh"]), lay["w_hh"], 0)
    rb = lay["bias"]
    slab = put(slab, reorder(params["b_lstm"]), rb, 0)
    slab = put(slab, params["b1"], rb + 1, 0)
    slab = put(slab, params["bg"], rb + 1, 2 * H)
    slab = put(slab, params["b2"], rb + 2, 0)
    slab = put(slab, params["b3"], rb + 2, 2 * H)
    slab = put(slab, params["wg_act"], rb + 3, 0)
    bhead = jnp.concatenate([params["bmu"], params["bsig"],
                             params["bcmu"], params["bcsig"]], axis=1)     # (1, 4A)
    slab = put(slab, bhead, rb + 4, 0)
    slab = put(slab, params["w1"], lay["w1g"], 0)
    slab = put(slab, params["wg_feat"], lay["w1g"], 2 * H)
    slab = put(slab, params["w2"], lay["w2w3"], 0)
    slab = put(slab, params["w3"], lay["w2w3"], 2 * H)
    # transposed block-diagonal head: rows = [wmu.T; wsig.T; wcmu.T; wcsig.T]
    wheadT = jnp.zeros((4 * A, 3 * H), jnp.float32)
    wheadT = wheadT.at[0:A, 0:2 * H].set(params["wmu"].T)
    wheadT = wheadT.at[A:2 * A, 0:2 * H].set(params["wsig"].T)
    wheadT = wheadT.at[2 * A:3 * A, 2 * H:3 * H].set(params["wcmu"].T)
    wheadT = wheadT.at[3 * A:4 * A, 2 * H:3 * H].set(params["wcsig"].T)
    slab = put(slab, wheadT, lay["wheadT"], 0)
    return slab, lay


# ------------------------------ forward wrapper ------------------------------ #
def actor_forward(slab, lay, s_nbtf, old_action, z, *, H):
    """s_nbtf: (N, B, T, F) batch_first tiles; old_action: (N, B, A); z: (N, 2)."""
    N, B, T, F = s_nbtf.shape
    A = old_action.shape[-1]
    assert A == 1  # wg_act broadcast-multiply and fused head packing assume n_action == 1

    # ---- pack (states | old_action | z) into one small per-tile VMEM buffer ----
    RIN = _pad8(T * B + B + 1)                    # 24
    LIN = max(F, A, 2)                            # 3
    s_tm = jnp.transpose(s_nbtf, (0, 2, 1, 3)).reshape(N, T * B, F)   # time-major
    inp = jnp.zeros((N, RIN, LIN), jnp.float32)
    inp = inp.at[:, 0:T * B, 0:F].set(s_tm)
    inp = inp.at[:, T * B:T * B + B, 0:A].set(old_action)
    inp = inp.at[:, T * B + B, 0:2].set(z)

    kernel = make_kernel(B, T, F, H, A, lay)

    out = pl.pallas_call(
        kernel,
        out_shape=jax.ShapeDtypeStruct((N, B, 8 * A), jnp.float32),
        grid=(N,),
        in_specs=[
            pl.BlockSpec((1, RIN, LIN), lambda n: (n, 0, 0)),
            pl.BlockSpec((lay["rows"], 128), lambda n: (0, 0)),   # VMEM-resident slab
        ],
        out_specs=pl.BlockSpec((1, B, 8 * A), lambda n: (n, 0, 0)),
        compiler_params=pltpu.CompilerParams(
            dimension_semantics=("parallel",)),
    )(inp, slab)

    return tuple(out[:, :, i * A:(i + 1) * A] for i in range(7))


# --------------------------- parameter init --------------------------------- #
def init_params(key, F, H, A):
    FE = H          # feature_extractor = n_hidden * n_layers * directions (1*1)
    LH = 2 * FE     # ActionModule.last_hidden

    def lin(k, fan_in, fan_out):
        k1, k2 = jax.random.split(k)
        bound = 1.0 / math.sqrt(fan_in)
        w = jax.random.uniform(k1, (fan_out, fan_in), jnp.float32, -bound, bound)
        b = jax.random.uniform(k2, (fan_out,), jnp.float32, -bound, bound)
        return w, b

    def normed_lin(k, fan_in, fan_out, scale=0.1):
        w, b = lin(k, fan_in, fan_out)
        w = w * scale / jnp.linalg.norm(w, axis=1, keepdims=True)
        return w, b

    ks = list(jax.random.split(key, 12))

    # LSTM (PyTorch layout: (4H, F), (4H, H), biases (4H,), all U(-1/sqrt(H), 1/sqrt(H)))
    bd = 1.0 / math.sqrt(H)
    k0a, k0b, k0c, k0d = jax.random.split(ks[0], 4)
    w_ih = jax.random.uniform(k0a, (4 * H, F), jnp.float32, -bd, bd)
    w_hh = jax.random.uniform(k0b, (4 * H, H), jnp.float32, -bd, bd)
    b_ih = jax.random.uniform(k0c, (4 * H,), jnp.float32, -bd, bd)
    b_hh = jax.random.uniform(k0d, (4 * H,), jnp.float32, -bd, bd)

    w1, b1 = lin(ks[1], FE, LH)
    w2, b2 = lin(ks[2], LH, LH)
    w3, b3 = lin(ks[3], LH, LH)
    wmu, bmu = normed_lin(ks[4], LH, A)
    wsig, bsig = normed_lin(ks[5], LH, A)
    # GlucoseModel: fc_layer1 Linear(FE + A, FE), NormedLinear heads (FE -> A)
    wg, bg = lin(ks[6], FE + A, FE)
    wcmu, bcmu = normed_lin(ks[7], FE, A)
    wcsig, bcsig = normed_lin(ks[8], FE, A)

    return {
        "w_ih": w_ih.T, "w_hh": w_hh.T, "b_lstm": (b_ih + b_hh).reshape(1, 4 * H),
        "w1": w1.T, "b1": b1.reshape(1, LH),
        "w2": w2.T, "b2": b2.reshape(1, LH),
        "w3": w3.T, "b3": b3.reshape(1, LH),
        "wmu": wmu.T, "bmu": bmu.reshape(1, A),
        "wsig": wsig.T, "bsig": bsig.reshape(1, A),
        "wg_feat": wg[:, :FE].T, "wg_act": wg[:, FE:].T, "bg": bg.reshape(1, FE),
        "wcmu": wcmu.T, "bcmu": bcmu.reshape(1, A),
        "wcsig": wcsig.T, "bcsig": bcsig.reshape(1, A),
    }


# ------------------------- pure-JAX reference ------------------------------- #
def reference_forward(p, s_btf, old_action, z):
    B, T, F = s_btf.shape
    H = p["w_hh"].shape[0]
    h = jnp.zeros((B, H), jnp.float32)
    c = jnp.zeros((B, H), jnp.float32)
    for t in range(T):
        gates = s_btf[:, t, :] @ p["w_ih"] + h @ p["w_hh"] + p["b_lstm"]
        i = jax.nn.sigmoid(gates[:, :H]); f = jax.nn.sigmoid(gates[:, H:2 * H])
        g = jnp.tanh(gates[:, 2 * H:3 * H]); o = jax.nn.sigmoid(gates[:, 3 * H:])
        c = f * c + i * g
        h = o * jnp.tanh(c)
    x1 = jax.nn.relu(h @ p["w1"] + p["b1"])
    x2 = jax.nn.relu(x1 @ p["w2"] + p["b2"])
    x3 = jax.nn.relu(x2 @ p["w3"] + p["b3"])
    mu = jnp.tanh(x3 @ p["wmu"] + p["bmu"])
    sigma = jax.nn.sigmoid(x3 @ p["wsig"] + p["bsig"] + 1e-5)
    action = jnp.clip(mu + sigma * z[0], -1.0, 1.0)
    a0 = action[0:1, :]
    log_prob = -((a0 - mu) ** 2) / (2 * sigma**2) - jnp.log(sigma) - 0.5 * jnp.log(2 * jnp.pi)
    g1 = jax.nn.relu(h @ p["wg_feat"] + old_action @ p["wg_act"] + p["bg"])
    cgm_mu = jnp.tanh(g1 @ p["wcmu"] + p["bcmu"])
    cgm_sigma = jax.nn.softplus(g1 @ p["wcsig"] + p["bcsig"] + 1e-5)
    cgm = jnp.clip(cgm_mu + cgm_sigma * z[1], -1.0, 1.0)
    return mu, sigma, action, log_prob, cgm_mu, cgm_sigma, cgm


# --------------------------------- main ------------------------------------- #
if __name__ == "__main__":
    # N env shards, batch=2 per shard, seq=8, n_features=3, n_hidden=32, n_action=1
    N, B, T, F, H, A = 8, 2, 8, 3, 32, 1

    key = jax.random.PRNGKey(0)
    kp, ks, ka, kz = jax.random.split(key, 4)

    params = init_params(kp, F, H, A)
    slab, lay = pack_for_kernel(params, F, H, A)

    s = jax.random.normal(ks, (N, B, T, F), jnp.float32)            # batch_first tiles
    old_action = jax.random.uniform(ka, (N, B, A), jnp.float32, -1.0, 1.0)
    # TODO(synk): torch.distributions.Normal(0,1).sample() has no in-kernel
    # equivalent; the N(0,1) samples are drawn host-side and packed into the
    # per-tile input buffer.
    z = jax.random.normal(kz, (N, 2), jnp.float32)

    outs = actor_forward(slab, lay, s, old_action, z, H=H)
    outs = jax.block_until_ready(outs)

    ref_rows = [reference_forward(params, s[n], old_action[n], z[n]) for n in range(N)]
    refs = tuple(jnp.stack([r[i] for r in ref_rows], axis=0) for i in range(7))
    for o, r in zip(outs, refs):
        assert o.shape == r.shape and o.dtype == jnp.float32
        assert jnp.allclose(o, r, atol=1e-5, rtol=1e-5)

    print("KERNEL_OK")
</pallas_src>

<mosaic_0001>
module attributes {stable_mosaic.version = 11 : i64} {
  func.func @kernel(%arg0: i32, %arg1: memref<1x24x3xf32, #tpu.memory_space<vmem>>, %arg2: memref<152x128xf32, #tpu.memory_space<vmem>>, %arg3: memref<1x2x8xf32, #tpu.memory_space<vmem>>) attributes {dimension_semantics = [#tpu.dimension_semantics<parallel>], iteration_bounds = array<i64: 8>, scalar_prefetch = 0 : i64, scratch_operands = 0 : i64, tpu.core_type = #tpu.core_type<tc>, window_params = [{transform_indices = @transform_0, window_bounds = array<i64: 1, 24, 3>}, {pipeline_mode = #tpu.pipeline_mode<synchronous>, transform_indices = @transform_1, window_bounds = array<i64: 152, 128>}, {transform_indices = @transform_2, window_bounds = array<i64: 1, 2, 8>}]} {
    %c0 = arith.constant 0 : index
    %c0_0 = arith.constant 0 : index
    %0 = vector.load %arg2[%c0, %c0_0] : memref<152x128xf32, #tpu.memory_space<vmem>>, vector<3x128xf32>
    %c8 = arith.constant 8 : index
    %c0_1 = arith.constant 0 : index
    %1 = vector.load %arg2[%c8, %c0_1] : memref<152x128xf32, #tpu.memory_space<vmem>>, vector<32x128xf32>
    %c40 = arith.constant 40 : index
    %c0_2 = arith.constant 0 : index
    %2 = vector.load %arg2[%c40, %c0_2] : memref<152x128xf32, #tpu.memory_space<vmem>>, vector<1x128xf32>
    %c41 = arith.constant 41 : index
    %c0_3 = arith.constant 0 : index
    %3 = vector.load %arg2[%c41, %c0_3] : memref<152x128xf32, #tpu.memory_space<vmem>>, vector<1x96xf32>
    %c42 = arith.constant 42 : index
    %c0_4 = arith.constant 0 : index
    %4 = vector.load %arg2[%c42, %c0_4] : memref<152x128xf32, #tpu.memory_space<vmem>>, vector<1x64xf32>
    %c42_5 = arith.constant 42 : index
    %c64 = arith.constant 64 : index
    %5 = vector.load %arg2[%c42_5, %c64] : memref<152x128xf32, #tpu.memory_space<vmem>>, vector<1x64xf32>
    %c43 = arith.constant 43 : index
    %c0_6 = arith.constant 0 : index
    %6 = vector.load %arg2[%c43, %c0_6] : memref<152x128xf32, #tpu.memory_space<vmem>>, vector<1x32xf32>
    %c44 = arith.constant 44 : index
    %c0_7 = arith.constant 0 : index
    %7 = vector.load %arg2[%c44, %c0_7] : memref<152x128xf32, #tpu.memory_space<vmem>>, vector<1x4xf32>
    %c48 = arith.constant 48 : index
    %c0_8 = arith.constant 0 : index
    %8 = vector.load %arg2[%c48, %c0_8] : memref<152x128xf32, #tpu.memory_space<vmem>>, vector<32x96xf32>
    %c80 = arith.constant 80 : index
    %c0_9 = arith.constant 0 : index
    %9 = vector.load %arg2[%c80, %c0_9] : memref<152x128xf32, #tpu.memory_space<vmem>>, vector<64x64xf32>
    %c80_10 = arith.constant 80 : index
    %c64_11 = arith.constant 64 : index
    %10 = vector.load %arg2[%c80_10, %c64_11] : memref<152x128xf32, #tpu.memory_space<vmem>>, vector<64x64xf32>
    %c144 = arith.constant 144 : index
    %c0_12 = arith.constant 0 : index
    %11 = vector.load %arg2[%c144, %c0_12] : memref<152x128xf32, #tpu.memory_space<vmem>>, vector<4x96xf32>
    %c0_13 = arith.constant 0 : index
    %c0_14 = arith.constant 0 : index
    %c0_15 = arith.constant 0 : index
    %12 = vector.load %arg1[%c0_13, %c0_14, %c0_15] : memref<1x24x3xf32, #tpu.memory_space<vmem>>, vector<1x24x3xf32>
    %13 = vector.shape_cast %12 : vector<1x24x3xf32> to vector<24x3xf32>
    %14 = vector.extract_strided_slice %13 {offsets = [0, 0], sizes = [16, 3], strides = [1, 1]} : vector<24x3xf32> to vector<16x3xf32>
    %15 = vector.extract_strided_slice %13 {offsets = [16, 0], sizes = [2, 1], strides = [1, 1]} : vector<24x3xf32> to vector<2x1xf32>
    %16 = vector.extract_strided_slice %13 {offsets = [18, 0], sizes = [1, 1], strides = [1, 1]} : vector<24x3xf32> to vector<1x1xf32>
    %17 = vector.extract_strided_slice %13 {offsets = [18, 1], sizes = [1, 1], strides = [1, 1]} : vector<24x3xf32> to vector<1x1xf32>
    %cst = arith.constant dense<0.000000e+00> : vector<16x128xf32>
    %18 = tpu.matmul %14, %0, %cst {dimension_numbers = #tpu.dot_dimension_numbers<[1], [0], [0], [1], [0, 0, 1, 1], [], []>} : vector<16x3xf32>, vector<3x128xf32>, vector<16x128xf32> -> vector<16x128xf32>
    %19 = vector.broadcast %2 : vector<1x128xf32> to vector<16x128xf32>
    %20 = arith.addf %18, %19 : vector<16x128xf32>
    %cst_16 = arith.constant 0.000000e+00 : f32
    %21 = vector.broadcast %cst_16 : f32 to vector<2x32xf32>
    %cst_17 = arith.constant 0.000000e+00 : f32
    %22 = vector.broadcast %cst_17 : f32 to vector<2x32xf32>
    %23 = vector.extract_strided_slice %20 {offsets = [0, 0], sizes = [2, 128], strides = [1, 1]} : vector<16x128xf32> to vector<2x128xf32>
    %cst_18 = arith.constant dense<0.000000e+00> : vector<2x128xf32>
    %24 = tpu.matmul %21, %1, %cst_18 {dimension_numbers = #tpu.dot_dimension_numbers<[1], [0], [0], [1], [0, 0, 1, 1], [], []>} : vector<2x32xf32>, vector<32x128xf32>, vector<2x128xf32> -> vector<2x128xf32>
    %25 = arith.addf %23, %24 : vector<2x128xf32>
    %26 = vector.extract_strided_slice %25 {offsets = [0, 0], sizes = [2, 96], strides = [1, 1]} : vector<2x128xf32> to vector<2x96xf32>
    %27 = arith.negf %26 : vector<2x96xf32>
    %28 = math.exp %27 : vector<2x96xf32>
    %cst_19 = arith.constant 1.000000e+00 : f32
    %29 = vector.broadcast %cst_19 : f32 to vector<2x96xf32>
    %30 = arith.addf %29, %28 : vector<2x96xf32>
    %31 = arith.divf %29, %30 : vector<2x96xf32>
    %32 = vector.extract_strided_slice %25 {offsets = [0, 96], sizes = [2, 32], strides = [1, 1]} : vector<2x128xf32> to vector<2x32xf32>
    %33 = math.tanh %32 : vector<2x32xf32>
    %34 = vector.extract_strided_slice %31 {offsets = [0, 32], sizes = [2, 32], strides = [1, 1]} : vector<2x96xf32> to vector<2x32xf32>
    %35 = arith.mulf %34, %22 : vector<2x32xf32>
    %36 = vector.extract_strided_slice %31 {offsets = [0, 0], sizes = [2, 32], strides = [1, 1]} : vector<2x96xf32> to vector<2x32xf32>
    %37 = arith.mulf %36, %33 : vector<2x32xf32>
    %38 = arith.addf %35, %37 : vector<2x32xf32>
    %39 = vector.extract_strided_slice %31 {offsets = [0, 64], sizes = [2, 32], strides = [1, 1]} : vector<2x96xf32> to vector<2x32xf32>
    %40 = math.tanh %38 : vector<2x32xf32>
    %41 = arith.mulf %39, %40 : vector<2x32xf32>
    %42 = vector.extract_strided_slice %20 {offsets = [2, 0], sizes = [2, 128], strides = [1, 1]} : vector<16x128xf32> to vector<2x128xf32>
    %cst_20 = arith.constant dense<0.000000e+00> : vector<2x128xf32>
    %43 = tpu.matmul %41, %1, %cst_20 {dimension_numbers = #tpu.dot_dimension_numbers<[1], [0], [0], [1], [0, 0, 1, 1], [], []>} : vector<2x32xf32>, vector<32x128xf32>, vector<2x128xf32> -> vector<2x128xf32>
    %44 = arith.addf %42, %43 : vector<2x128xf32>
    %45 = vector.extract_strided_slice %44 {offsets = [0, 0], sizes = [2, 96], strides = [1, 1]} : vector<2x128xf32> to vector<2x96xf32>
    %46 = arith.negf %45 : vector<2x96xf32>
    %47 = math.exp %46 : vector<2x96xf32>
    %cst_21 = arith.constant 1.000000e+00 : f32
    %48 = vector.broadcast %cst_21 : f32 to vector<2x96xf32>
    %49 = arith.addf %48, %47 : vector<2x96xf32>
    %50 = arith.divf %48, %49 : vector<2x96xf32>
    %51 = vector.extract_strided_slice %44 {offsets = [0, 96], sizes = [2, 32], strides = [1, 1]} : vector<2x128xf32> to vector<2x32xf32>
    %52 = math.tanh %51 : vector<2x32xf32>
    %53 = vector.extract_strided_slice %50 {offsets = [0, 32], sizes = [2, 32], strides = [1, 1]} : vector<2x96xf32> to vector<2x32xf32>
    %54 = arith.mulf %53, %38 : vector<2x32xf32>
    %55 = vector.extract_strided_slice %50 {offsets = [0, 0], sizes = [2, 32], strides = [1, 1]} : vector<2x96xf32> to vector<2x32xf32>
    %56 = arith.mulf %55, %52 : vector<2x32xf32>
    %57 = arith.addf %54, %56 : vector<2x32xf32>
    %58 = vector.extract_strided_slice %50 {offsets = [0, 64], sizes = [2, 32], strides = [1, 1]} : vector<2x96xf32> to vector<2x32xf32>
    %59 = math.tanh %57 : vector<2x32xf32>
    %60 = arith.mulf %58, %59 : vector<2x32xf32>
    %61 = vector.extract_strided_slice %20 {offsets = [4, 0], sizes = [2, 128], strides = [1, 1]} : vector<16x128xf32> to vector<2x128xf32>
    %cst_22 = arith.constant dense<0.000000e+00> : vector<2x128xf32>
    %62 = tpu.matmul %60, %1, %cst_22 {dimension_numbers = #tpu.dot_dimension_numbers<[1], [0], [0], [1], [0, 0, 1, 1], [], []>} : vector<2x32xf32>, vector<32x128xf32>, vector<2x128xf32> -> vector<2x128xf32>
    %63 = arith.addf %61, %62 : vector<2x128xf32>
    %64 = vector.extract_strided_slice %63 {offsets = [0, 0], sizes = [2, 96], strides = [1, 1]} : vector<2x128xf32> to vector<2x96xf32>
    %65 = arith.negf %64 : vector<2x96xf32>
    %66 = math.exp %65 : vector<2x96xf32>
    %cst_23 = arith.constant 1.000000e+00 : f32
    %67 = vector.broadcast %cst_23 : f32 to vector<2x96xf32>
    %68 = arith.addf %67, %66 : vector<2x96xf32>
    %69 = arith.divf %67, %68 : vector<2x96xf32>
    %70 = vector.extract_strided_slice %63 {offsets = [0, 96], sizes = [2, 32], strides = [1, 1]} : vector<2x128xf32> to vector<2x32xf32>
    %71 = math.tanh %70 : vector<2x32xf32>
    %72 = vector.extract_strided_slice %69 {offsets = [0, 32], sizes = [2, 32], strides = [1, 1]} : vector<2x96xf32> to vector<2x32xf32>
    %73 = arith.mulf %72, %57 : vector<2x32xf32>
    %74 = vector.extract_strided_slice %69 {offsets = [0, 0], sizes = [2, 32], strides = [1, 1]} : vector<2x96xf32> to vector<2x32xf32>
    %75 = arith.mulf %74, %71 : vector<2x32xf32>
    %76 = arith.addf %73, %75 : vector<2x32xf32>
    %77 = vector.extract_strided_slice %69 {offsets = [0, 64], sizes = [2, 32], strides = [1, 1]} : vector<2x96xf32> to vector<2x32xf32>
    %78 = math.tanh %76 : vector<2x32xf32>
    %79 = arith.mulf %77, %78 : vector<2x32xf32>
    %80 = vector.extract_strided_slice %20 {offsets = [6, 0], sizes = [2, 128], strides = [1, 1]} : vector<16x128xf32> to vector<2x128xf32>
    %cst_24 = arith.constant dense<0.000000e+00> : vector<2x128xf32>
    %81 = tpu.matmul %79, %1, %cst_24 {dimension_numbers = #tpu.dot_dimension_numbers<[1], [0], [0], [1], [0, 0, 1, 1], [], []>} : vector<2x32xf32>, vector<32x128xf32>, vector<2x128xf32> -> vector<2x128xf32>
    %82 = arith.addf %80, %81 : vector<2x128xf32>
    %83 = vector.extract_strided_slice %82 {offsets = [0, 0], sizes = [2, 96], strides = [1, 1]} : vector<2x128xf32> to vector<2x96xf32>
    %84 = arith.negf %83 : vector<2x96xf32>
    %85 = math.exp %84 : vector<2x96xf32>
    %cst_25 = arith.constant 1.000000e+00 : f32
    %86 = vector.broadcast %cst_25 : f32 to vector<2x96xf32>
    %87 = arith.addf %86, %85 : vector<2x96xf32>
    %88 = arith.divf %86, %87 : vector<2x96xf32>
    %89 = vector.extract_strided_slice %82 {offsets = [0, 96], sizes = [2, 32], strides = [1, 1]} : vector<2x128xf32> to vector<2x32xf32>
    %90 = math.tanh %89 : vector<2x32xf32>
    %91 = vector.extract_strided_slice %88 {offsets = [0, 32], sizes = [2, 32], strides = [1, 1]} : vector<2x96xf32> to vector<2x32xf32>
    %92 = arith.mulf %91, %76 : vector<2x32xf32>
    %93 = vector.extract_strided_slice %88 {offsets = [0, 0], sizes = [2, 32], strides = [1, 1]} : vector<2x96xf32> to vector<2x32xf32>
    %94 = arith.mulf %93, %90 : vector<2x32xf32>
    %95 = arith.addf %92, %94 : vector<2x32xf32>
    %96 = vector.extract_strided_slice %88 {offsets = [0, 64], sizes = [2, 32], strides = [1, 1]} : vector<2x96xf32> to vector<2x32xf32>
    %97 = math.tanh %95 : vector<2x32xf32>
    %98 = arith.mulf %96, %97 : vector<2x32xf32>
    %99 = vector.extract_strided_slice %20 {offsets = [8, 0], sizes = [2, 128], strides = [1, 1]} : vector<16x128xf32> to vector<2x128xf32>
    %cst_26 = arith.constant dense<0.000000e+00> : vector<2x128xf32>
    %100 = tpu.matmul %98, %1, %cst_26 {dimension_numbers = #tpu.dot_dimension_numbers<[1], [0], [0], [1], [0, 0, 1, 1], [], []>} : vector<2x32xf32>, vector<32x128xf32>, vector<2x128xf32> -> vector<2x128xf32>
    %101 = arith.addf %99, %100 : vector<2x128xf32>
    %102 = vector.extract_strided_slice %101 {offsets = [0, 0], sizes = [2, 96], strides = [1, 1]} : vector<2x128xf32> to vector<2x96xf32>
    %103 = arith.negf %102 : vector<2x96xf32>
    %104 = math.exp %103 : vector<2x96xf32>
    %cst_27 = arith.constant 1.000000e+00 : f32
    %105 = vector.broadcast %cst_27 : f32 to vector<2x96xf32>
    %106 = arith.addf %105, %104 : vector<2x96xf32>
    %107 = arith.divf %105, %106 : vector<2x96xf32>
    %108 = vector.extract_strided_slice %101 {offsets = [0, 96], sizes = [2, 32], strides = [1, 1]} : vector<2x128xf32> to vector<2x32xf32>
    %109 = math.tanh %108 : vector<2x32xf32>
    %110 = vector.extract_strided_slice %107 {offsets = [0, 32], sizes = [2, 32], strides = [1, 1]} : vector<2x96xf32> to vector<2x32xf32>
    %111 = arith.mulf %110, %95 : vector<2x32xf32>
    %112 = vector.extract_strided_slice %107 {offsets = [0, 0], sizes = [2, 32], strides = [1, 1]} : vector<2x96xf32> to vector<2x32xf32>
    %113 = arith.mulf %112, %109 : vector<2x32xf32>
    %114 = arith.addf %111, %113 : vector<2x32xf32>
    %115 = vector.extract_strided_slice %107 {offsets = [0, 64], sizes = [2, 32], strides = [1, 1]} : vector<2x96xf32> to vector<2x32xf32>
    %116 = math.tanh %114 : vector<2x32xf32>
    %117 = arith.mulf %115, %116 : vector<2x32xf32>
    %118 = vector.extract_strided_slice %20 {offsets = [10, 0], sizes = [2, 128], strides = [1, 1]} : vector<16x128xf32> to vector<2x128xf32>
    %cst_28 = arith.constant dense<0.000000e+00> : vector<2x128xf32>
    %119 = tpu.matmul %117, %1, %cst_28 {dimension_numbers = #tpu.dot_dimension_numbers<[1], [0], [0], [1], [0, 0, 1, 1], [], []>} : vector<2x32xf32>, vector<32x128xf32>, vector<2x128xf32> -> vector<2x128xf32>
    %120 = arith.addf %118, %119 : vector<2x128xf32>
    %121 = vector.extract_strided_slice %120 {offsets = [0, 0], sizes = [2, 96], strides = [1, 1]} : vector<2x128xf32> to vector<2x96xf32>
    %122 = arith.negf %121 : vector<2x96xf32>
    %123 = math.exp %122 : vector<2x96xf32>
    %cst_29 = arith.constant 1.000000e+00 : f32
    %124 = vector.broadcast %cst_29 : f32 to vector<2x96xf32>
    %125 = arith.addf %124, %123 : vector<2x96xf32>
    %126 = arith.divf %124, %125 : vector<2x96xf32>
    %127 = vector.extract_strided_slice %120 {offsets = [0, 96], sizes = [2, 32], strides = [1, 1]} : vector<2x128xf32> to vector<2x32xf32>
    %128 = math.tanh %127 : vector<2x32xf32>
    %129 = vector.extract_strided_slice %126 {offsets = [0, 32], sizes = [2, 32], strides = [1, 1]} : vector<2x96xf32> to vector<2x32xf32>
    %130 = arith.mulf %129, %114 : vector<2x32xf32>
    %131 = vector.extract_strided_slice %126 {offsets = [0, 0], sizes = [2, 32], strides = [1, 1]} : vector<2x96xf32> to vector<2x32xf32>
    %132 = arith.mulf %131, %128 : vector<2x32xf32>
    %133 = arith.addf %130, %132 : vector<2x32xf32>
    %134 = vector.extract_strided_slice %126 {offsets = [0, 64], sizes = [2, 32], strides = [1, 1]} : vector<2x96xf32> to vector<2x32xf32>
    %135 = math.tanh %133 : vector<2x32xf32>
    %136 = arith.mulf %134, %135 : vector<2x32xf32>
    %137 = vector.extract_strided_slice %20 {offsets = [12, 0], sizes = [2, 128], strides = [1, 1]} : vector<16x128xf32> to vector<2x128xf32>
    %cst_30 = arith.constant dense<0.000000e+00> : vector<2x128xf32>
    %138 = tpu.matmul %136, %1, %cst_30 {dimension_numbers = #tpu.dot_dimension_numbers<[1], [0], [0], [1], [0, 0, 1, 1], [], []>} : vector<2x32xf32>, vector<32x128xf32>, vector<2x128xf32> -> vector<2x128xf32>
    %139 = arith.addf %137, %138 : vector<2x128xf32>
    %140 = vector.extract_strided_slice %139 {offsets = [0, 0], sizes = [2, 96], strides = [1, 1]} : vector<2x128xf32> to vector<2x96xf32>
    %141 = arith.negf %140 : vector<2x96xf32>
    %142 = math.exp %141 : vector<2x96xf32>
    %cst_31 = arith.constant 1.000000e+00 : f32
    %143 = vector.broadcast %cst_31 : f32 to vector<2x96xf32>
    %144 = arith.addf %143, %142 : vector<2x96xf32>
    %145 = arith.divf %143, %144 : vector<2x96xf32>
    %146 = vector.extract_strided_slice %139 {offsets = [0, 96], sizes = [2, 32], strides = [1, 1]} : vector<2x128xf32> to vector<2x32xf32>
    %147 = math.tanh %146 : vector<2x32xf32>
    %148 = vector.extract_strided_slice %145 {offsets = [0, 32], sizes = [2, 32], strides = [1, 1]} : vector<2x96xf32> to vector<2x32xf32>
    %149 = arith.mulf %148, %133 : vector<2x32xf32>
    %150 = vector.extract_strided_slice %145 {offsets = [0, 0], sizes = [2, 32], strides = [1, 1]} : vector<2x96xf32> to vector<2x32xf32>
    %151 = arith.mulf %150, %147 : vector<2x32xf32>
    %152 = arith.addf %149, %151 : vector<2x32xf32>
    %153 = vector.extract_strided_slice %145 {offsets = [0, 64], sizes = [2, 32], strides = [1, 1]} : vector<2x96xf32> to vector<2x32xf32>
    %154 = math.tanh %152 : vector<2x32xf32>
    %155 = arith.mulf %153, %154 : vector<2x32xf32>
    %156 = vector.extract_strided_slice %20 {offsets = [14, 0], sizes = [2, 128], strides = [1, 1]} : vector<16x128xf32> to vector<2x128xf32>
    %cst_32 = arith.constant dense<0.000000e+00> : vector<2x128xf32>
    %157 = tpu.matmul %155, %1, %cst_32 {dimension_numbers = #tpu.dot_dimension_numbers<[1], [0], [0], [1], [0, 0, 1, 1], [], []>} : vector<2x32xf32>, vector<32x128xf32>, vector<2x128xf32> -> vector<2x128xf32>
    %158 = arith.addf %156, %157 : vector<2x128xf32>
    %159 = vector.extract_strided_slice %158 {offsets = [0, 0], sizes = [2, 96], strides = [1, 1]} : vector<2x128xf32> to vector<2x96xf32>
    %160 = arith.negf %159 : vector<2x96xf32>
    %161 = math.exp %160 : vector<2x96xf32>
    %cst_33 = arith.constant 1.000000e+00 : f32
    %162 = vector.broadcast %cst_33 : f32 to vector<2x96xf32>
    %163 = arith.addf %162, %161 : vector<2x96xf32>
    %164 = arith.divf %162, %163 : vector<2x96xf32>
    %165 = vector.extract_strided_slice %158 {offsets = [0, 96], sizes = [2, 32], strides = [1, 1]} : vector<2x128xf32> to vector<2x32xf32>
    %166 = math.tanh %165 : vector<2x32xf32>
    %167 = vector.extract_strided_slice %164 {offsets = [0, 32], sizes = [2, 32], strides = [1, 1]} : vector<2x96xf32> to vector<2x32xf32>
    %168 = arith.mulf %167, %152 : vector<2x32xf32>
    %169 = vector.extract_strided_slice %164 {offsets = [0, 0], sizes = [2, 32], strides = [1, 1]} : vector<2x96xf32> to vector<2x32xf32>
    %170 = arith.mulf %169, %166 : vector<2x32xf32>
    %171 = arith.addf %168, %170 : vector<2x32xf32>
    %172 = vector.extract_strided_slice %164 {offsets = [0, 64], sizes = [2, 32], strides = [1, 1]} : vector<2x96xf32> to vector<2x32xf32>
    %173 = math.tanh %171 : vector<2x32xf32>
    %174 = arith.mulf %172, %173 : vector<2x32xf32>
    %cst_34 = arith.constant dense<0.000000e+00> : vector<2x96xf32>
    %175 = tpu.matmul %174, %8, %cst_34 {dimension_numbers = #tpu.dot_dimension_numbers<[1], [0], [0], [1], [0, 0, 1, 1], [], []>} : vector<2x32xf32>, vector<32x96xf32>, vector<2x96xf32> -> vector<2x96xf32>
    %176 = vector.broadcast %3 : vector<1x96xf32> to vector<2x96xf32>
    %177 = arith.addf %175, %176 : vector<2x96xf32>
    %178 = vector.extract_strided_slice %177 {offsets = [0, 0], sizes = [2, 64], strides = [1, 1]} : vector<2x96xf32> to vector<2x64xf32>
    %cst_35 = arith.constant 0.000000e+00 : f32
    %179 = vector.broadcast %cst_35 : f32 to vector<2x64xf32>
    %180 = arith.maximumf %178, %179 : vector<2x64xf32>
    %181 = vector.extract_strided_slice %177 {offsets = [0, 64], sizes = [2, 32], strides = [1, 1]} : vector<2x96xf32> to vector<2x32xf32>
    %182 = vector.broadcast %15 : vector<2x1xf32> to vector<2x32xf32>
    %183 = vector.broadcast %6 : vector<1x32xf32> to vector<2x32xf32>
    %184 = arith.mulf %182, %183 : vector<2x32xf32>
    %185 = arith.addf %181, %184 : vector<2x32xf32>
    %cst_36 = arith.constant 0.000000e+00 : f32
    %186 = vector.broadcast %cst_36 : f32 to vector<2x32xf32>
    %187 = arith.maximumf %185, %186 : vector<2x32xf32>
    %cst_37 = arith.constant dense<0.000000e+00> : vector<2x64xf32>
    %188 = tpu.matmul %180, %9, %cst_37 {dimension_numbers = #tpu.dot_dimension_numbers<[1], [0], [0], [1], [0, 0, 1, 1], [], []>} : vector<2x64xf32>, vector<64x64xf32>, vector<2x64xf32> -> vector<2x64xf32>
    %189 = vector.broadcast %4 : vector<1x64xf32> to vector<2x64xf32>
    %190 = arith.addf %188, %189 : vector<2x64xf32>
    %cst_38 = arith.constant 0.000000e+00 : f32
    %191 = vector.broadcast %cst_38 : f32 to vector<2x64xf32>
    %192 = arith.maximumf %190, %191 : vector<2x64xf32>
    %cst_39 = arith.constant dense<0.000000e+00> : vector<2x64xf32>
    %193 = tpu.matmul %192, %10, %cst_39 {dimension_numbers = #tpu.dot_dimension_numbers<[1], [0], [0], [1], [0, 0, 1, 1], [], []>} : vector<2x64xf32>, vector<64x64xf32>, vector<2x64xf32> -> vector<2x64xf32>
    %194 = vector.broadcast %5 : vector<1x64xf32> to vector<2x64xf32>
    %195 = arith.addf %193, %194 : vector<2x64xf32>
    %cst_40 = arith.constant 0.000000e+00 : f32
    %196 = vector.broadcast %cst_40 : f32 to vector<2x64xf32>
    %197 = arith.maximumf %195, %196 : vector<2x64xf32>
    %198 = tpu.concatenate %197, %187 in 1 : vector<2x64xf32>, vector<2x32xf32> -> vector<2x96xf32>
    %cst_41 = arith.constant dense<0.000000e+00> : vector<2x4xf32>
    %199 = tpu.matmul %198, %11, %cst_41 {dimension_numbers = #tpu.dot_dimension_numbers<[1], [1], [0], [0], [0, 0, 1, 0], [], []>} : vector<2x96xf32>, vector<4x96xf32>, vector<2x4xf32> -> vector<2x4xf32>
    %200 = vector.broadcast %7 : vector<1x4xf32> to vector<2x4xf32>
    %201 = arith.addf %199, %200 : vector<2x4xf32>
    %202 = vector.extract_strided_slice %201 {offsets = [0, 0], sizes = [2, 1], strides = [1, 1]} : vector<2x4xf32> to vector<2x1xf32>
    %203 = math.tanh %202 : vector<2x1xf32>
    %204 = vector.extract_strided_slice %201 {offsets = [0, 1], sizes = [2, 1], strides = [1, 1]} : vector<2x4xf32> to vector<2x1xf32>
    %cst_42 = arith.constant 9.99999974E-6 : f32
    %205 = vector.broadcast %cst_42 : f32 to vector<2x1xf32>
    %206 = arith.addf %204, %205 : vector<2x1xf32>
    %207 = arith.negf %206 : vector<2x1xf32>
    %208 = math.exp %207 : vector<2x1xf32>
    %cst_43 = arith.constant 1.000000e+00 : f32
    %209 = vector.broadcast %cst_43 : f32 to vector<2x1xf32>
    %210 = arith.addf %209, %208 : vector<2x1xf32>
    %211 = arith.divf %209, %210 : vector<2x1xf32>
    %212 = vector.extract_strided_slice %201 {offsets = [0, 2], sizes = [2, 1], strides = [1, 1]} : vector<2x4xf32> to vector<2x1xf32>
    %213 = math.tanh %212 : vector<2x1xf32>
    %214 = vector.extract_strided_slice %201 {offsets = [0, 3], sizes = [2, 1], strides = [1, 1]} : vector<2x4xf32> to vector<2x1xf32>
    %cst_44 = arith.constant 9.99999974E-6 : f32
    %215 = vector.broadcast %cst_44 : f32 to vector<2x1xf32>
    %216 = arith.addf %214, %215 : vector<2x1xf32>
    %cst_45 = arith.constant 0.000000e+00 : f32
    %217 = vector.broadcast %cst_45 : f32 to vector<2x1xf32>
    %218 = arith.maximumf %216, %217 : vector<2x1xf32>
    %219 = vector.broadcast %cst_45 : f32 to vector<2x1xf32>
    %220 = arith.subf %216, %219 : vector<2x1xf32>
    %221 = arith.cmpf one, %220, %220 : vector<2x1xf32>
    %222 = vector.broadcast %cst_45 : f32 to vector<2x1xf32>
    %223 = arith.addf %216, %222 : vector<2x1xf32>
    %224 = math.absf %220 : vector<2x1xf32>
    %cst_46 = arith.constant 0.000000e+00 : f32
    %225 = vector.broadcast %cst_46 : f32 to vector<2x1xf32>
    %226 = arith.subf %225, %224 : vector<2x1xf32>
    %227 = math.exp %226 : vector<2x1xf32>
    %228 = math.log1p %227 : vector<2x1xf32>
    %229 = arith.addf %218, %228 : vector<2x1xf32>
    %230 = arith.select %221, %223, %229 : vector<2x1xi1>, vector<2x1xf32>
    %231 = vector.broadcast %16 : vector<1x1xf32> to vector<2x1xf32>
    %232 = arith.mulf %211, %231 : vector<2x1xf32>
    %233 = arith.addf %203, %232 : vector<2x1xf32>
    %cst_47 = arith.constant -1.000000e+00 : f32
    %cst_48 = arith.constant 1.000000e+00 : f32
    %234 = vector.broadcast %cst_47 : f32 to vector<2x1xf32>
    %235 = arith.maximumf %234, %233 : vector<2x1xf32>
    %236 = vector.broadcast %cst_48 : f32 to vector<2x1xf32>
    %237 = arith.minimumf %236, %235 : vector<2x1xf32>
    %238 = vector.broadcast %17 : vector<1x1xf32> to vector<2x1xf32>
    %239 = arith.mulf %230, %238 : vector<2x1xf32>
    %240 = arith.addf %213, %239 : vector<2x1xf32>
    %cst_49 = arith.constant -1.000000e+00 : f32
    %cst_50 = arith.constant 1.000000e+00 : f32
    %241 = vector.broadcast %cst_49 : f32 to vector<2x1xf32>
    %242 = arith.maximumf %241, %240 : vector<2x1xf32>
    %243 = vector.broadcast %cst_50 : f32 to vector<2x1xf32>
    %244 = arith.minimumf %243, %242 : vector<2x1xf32>
    %245 = vector.extract_strided_slice %237 {offsets = [0, 0], sizes = [1, 1], strides = [1, 1]} : vector<2x1xf32> to vector<1x1xf32>
    %246 = tpu.reciprocal %211 : vector<2x1xf32> -> vector<2x1xf32>
    %247 = vector.broadcast %245 : vector<1x1xf32> to vector<2x1xf32>
    %248 = arith.subf %247, %203 : vector<2x1xf32>
    %249 = arith.mulf %248, %246 : vector<2x1xf32>
    %cst_51 = arith.constant -5.000000e-01 : f32
    %250 = vector.broadcast %cst_51 : f32 to vector<2x1xf32>
    %251 = arith.mulf %250, %249 : vector<2x1xf32>
    %252 = arith.mulf %251, %249 : vector<2x1xf32>
    %253 = math.log %211 : vector<2x1xf32>
    %254 = arith.subf %252, %253 : vector<2x1xf32>
    %cst_52 = arith.constant 0.918938517 : f32
    %255 = vector.broadcast %cst_52 : f32 to vector<2x1xf32>
    %256 = arith.subf %254, %255 : vector<2x1xf32>
    %cst_53 = arith.constant 0.000000e+00 : f32
    %257 = vector.broadcast %cst_53 : f32 to vector<2x1xf32>
    %258 = tpu.concatenate %203, %211, %237, %256, %213, %230, %244, %257 in 1 : vector<2x1xf32>, vector<2x1xf32>, vector<2x1xf32>, vector<2x1xf32>, vector<2x1xf32>, vector<2x1xf32>, vector<2x1xf32>, vector<2x1xf32> -> vector<2x8xf32>
    %c0_54 = arith.constant 0 : index
    %c0_55 = arith.constant 0 : index
    %c0_56 = arith.constant 0 : index
    %259 = vector.load %arg3[%c0_54, %c0_55, %c0_56] : memref<1x2x8xf32, #tpu.memory_space<vmem>>, vector<1x2x8xf32>
    %260 = vector.shape_cast %259 : vector<1x2x8xf32> to vector<2x8xf32>
    %261 = vector.shape_cast %258 : vector<2x8xf32> to vector<1x2x8xf32>
    tpu.vector_store %arg3[%c0_54, %c0_55, %c0_56], %261 {strides = array<i32>} : memref<1x2x8xf32, #tpu.memory_space<vmem>>, vector<1x2x8xf32>,
    return
  }
  func.func @transform_0(%arg0: i32) -> (i32, i32, i32) {
    %c0_i32 = arith.constant 0 : i32
    %c0_i32_0 = arith.constant 0 : i32
    %c0_i32_1 = arith.constant 0 : i32
    return %arg0, %c0_i32, %c0_i32_0 : i32, i32, i32
  }
  func.func @transform_1(%arg0: i32) -> (i32, i32) {
    %c0_i32 = arith.constant 0 : i32
    %c0_i32_0 = arith.constant 0 : i32
    %c0_i32_1 = arith.constant 0 : i32
    return %c0_i32, %c0_i32_0 : i32, i32
  }
  func.func @transform_2(%arg0: i32) -> (i32, i32, i32) {
    %c0_i32 = arith.constant 0 : i32
    %c0_i32_0 = arith.constant 0 : i32
    %c0_i32_1 = arith.constant 0 : i32
    return %arg0, %c0_i32, %c0_i32_0 : i32, i32, i32
  }
}

</mosaic_0001>

<bundles_post_ra>
// kernel: tpu_custom_call.1
= control target key start
LH: loop header
LB: loop body
LE: loop exit
PB: predicated region body
PF: predicated region fallthrough
CT: control target
= control target key end

     0   :  { %7 = vsyncpa [#allocation3], 0  ;;  %s1669_s0 = inlined_call_operand.vmem [shape: f32[8,24,3], index: 0, kind: input, shape index: {}]   ;;  %s1670_s1 = inlined_call_operand.vmem [shape: f32[152,128], index: 1, kind: input, shape index: {}]   ;;  %s1671_s2 = inlined_call_operand.hbm [shape: f32[8,2,8], index: 2, kind: output, shape index: {}]  }
   0x1   :  { %9 = vsyncpa [#allocation3 + $0x1], 0  ;;  %s1389_s9 = smov 0   ;;  %s1391_s10 = smov 0  }
   0x2   :  { %s1393_s11 = smov 0   ;;  %s1395_s12 = smov 0  }
   0x3 LB: > { %s1410_s13 = sadd.s32 4294967295, %s1363_s12   ;;  %s1110_s14 = sadd.s32 4294967294, %s1363_s12   ;;  %s1363_s12 = sphi %s1395_s12, %s1677_s12   ;;  %s1359_s11 = sphi %s1393_s11, %s1676_s11   ;;  %s1355_s10 = sphi %s1391_s10, %s1675_s10   ;;  %s1351_s9 = sphi %s1389_s9, %s1674_s9  }
   0x4   : > { %s1414_s15 = sadd.s32 1, %s1363_s12   ;;  %s69_s16 = sadd.s32 1, %s1359_s11 }
   0x5   : > { %s66_s17 = ssub.s32 %s1363_s12, %s1414_s15  ;;  %p79_p0 = scmp.ne.s32.totalorder %s1359_s11, %s1355_s10 }
   0x6   : > { %p67_p1 = scmp.eq.s32.totalorder %s66_s17, 0  ;;  %p80_p2 = scmp.eq.s32.totalorder %s1410_s13, 7 }
   0x7   : > { %p85_p3 = scmp.ne.s32.totalorder %s1355_s10, %s1351_s9  ;;  %p86_p4 = scmp.eq.s32.totalorder %s1110_s14, 7 }
   0x8   : > { %s1425_s18 = scalar_select %p67_p1, %s1359_s11, %s69_s16  }
   0x9   : > { %p1427_p5 = por %p80_p2, %p79_p0  ;;  %p1431_p6 = por %p86_p4, %p85_p3 }
   0xa   : > { %p1113_p7 = scmp.ge.s32.totalorder %s1363_s12, 1  ;;  %p115_p8 = scmp.lt.s32.totalorder %s1363_s12, 9 }
   0xc   : > { %p116_p9 = pnand %p1113_p7, %p115_p8 }
   0xd   : > { %p137_p10 = scmp.lt.s32.totalorder (!%p116_p9), %s1410_s13, 7  ;;  %s1366_s16 = smov (!%p116_p9), 32  }
   0xe   : > { %119 = sbr.rel (%p116_p9) target bundleno = 5511 (0x1587), region = 28  ;;  %s1367_s17 = smov (!%p116_p9), 64  }
   0xf   : > { %s1370_s8 = smov (!%p116_p9), 2   ;;  %s1372_s21 = smov (!%p116_p9), 3  }
  0x10   : > { %s1373_s22 = smov (!%p116_p9), 4   ;;  %s134_s23 = sand.u32 (!%p116_p9), 1, %s1355_s10  }
  0x11   : > { %s1114_s24 = sshll.u32 (!%p116_p9), %s134_s23, 1  ;;  %s1144_s25 = sshll.u32 (!%p116_p9), %s1410_s13, 1 }
  0x12   : > { %s1046_s28 = scalar_lea.hbm (!%p116_p9), %s1671_s2, %s1144_s25 }
  0x13   : > { %v1440_v0 = vld [vmem:[%s1670_s1 + $0x20] sm:$0xff]  ;;  %v1445_v1 = vld [vmem:[%s1670_s1 + $0x18] sm:$0xff]  ;;  %vm176_vm0 = vcmask 1042432   ;;  %v1455_v3 = vld [vmem:[%s1670_s1 + $0x10] sm:$0xff]  ;;  %s138_s29 = scalar_select %p137_p10, %s1410_s13, 7  ;;  %vm169_vm1 = vcmask 23552  }
  0x14   : > { %v142_v2 = vld [vmem:[%s1670_s1] sm:$0x7]  ;;  %219 = vmatpush.msra.mxu1 %v1440_v0  ;;  %352 = vmatpush.msra.mxu3 %v1440_v0  ;;  %v1464_v4 = vld [vmem:[%s1670_s1 + $0x8] sm:$0xff]  ;;  %v1365_v6 = vmov 0.0   ;;  %vm203_vm6 = vcmask 261120   ;;  %s1050_s3 = sshll.u32 %s1046_s28, 4  ;;  %s1051_s3 = int_to_ptr.hbm [resolvable:$true] %s1050_s3 }
  0x15   : > { %1116 = vmatpush.msk.msra.mxu0 %vm176_vm0, %v142_v2  ;;  %1147 = vmatpush.msk.msra.mxu2 %vm176_vm0, %v142_v2  ;;  %s1148_s30 = smul.u32 24, %s138_s29  ;;  %v1500_v7 = vld [vmem:[%s1670_s1 + $0x28] ss:$0 sm:$0xff]  ;;  %s136_s29 = scalar_lea.vmem [#allocation2], %s1114_s24 }
  0x16   : > { %220 = vmatpush.msra.mxu1 %v1445_v1  ;;  %353 = vmatpush.msra.mxu3 %v1445_v1  ;;  %s1036_s13 = scalar_lea.sflag [#allocation3], %s134_s23  ;;  %s1315_s4 = sshra.s32 %s1051_s3, 4  ;;  %s1316_s4 = int_to_ptr.hbm [resolvable:$true] %s1315_s4 }
  0x17   : > { %282 = vmatpush.msrb.mxu2 %v1440_v0  ;;  %628 = vmatpush.msrb.mxu0 %v1440_v0  ;;  %s1473_s7 = scalar_lea.vmem %s1669_s0, %s1148_s30  ;;  %s1048_s30 = sshll.u32 %s136_s29, 4  ;;  %s1049_s30 = int_to_ptr.vmem [resolvable:$true] %s1048_s30 }
  0x18   : > { %221 = vmatpush.msra.mxu1 %v1455_v3  ;;  %354 = vmatpush.msra.mxu3 %v1455_v3  ;;  %v165_v5 = vld [vmem:[%s1473_s7] sm:$0xff]  ;;  %v166_v32 = vld [vmem:[%s1473_s7 + $0x8] sm:$0xff]  ;;  %s1317_s5 = scalar_lea.hbm %s1316_s4, 2  ;;  %p1322_p0 = scmp.lt.s32.totalorder %s1316_s4, %s1671_s2 }
  0x19   : > { %283 = vmatpush.msrb.mxu2 %v1445_v1  ;;  %629 = vmatpush.msrb.mxu0 %v1445_v1  ;;  %p1318_p11 = scmp.ne.s32.totalorder %s1316_s4, %s1317_s5 }
  0x1a   : > { %222 = vmatpush.msra.mxu1 %v1464_v4  ;;  %1117 = vmatmul.msk.f32.vlgmr.msra.gmra.mxu0 %vm169_vm1, %v165_v5 }
  0x1b   : > { %284 = vmatpush.msrb.mxu2 %v1455_v3  ;;  %223 = vmatmul.f32.vlgmr.msra.gmra.mxu1 %v1365_v6  ;;  %p1319_p12 = pnand %p1318_p11, %p1427_p5 }
  0x1c   : > { %355 = vmatpush.msra.mxu3 %v1464_v4  ;;  %422 = vmatpush.msrb.mxu1 %v1440_v0 }
  0x1d   : > { %285 = vmatpush.msrb.mxu2 %v1464_v4  ;;  %630 = vmatpush.msrb.mxu0 %v1455_v3  ;;  %p1320_p13 = pneg %p1319_p12 }
  0x1e   : > { %558 = vmatpush.msrb.mxu3 %v1440_v0  ;;  %423 = vmatpush.msrb.mxu1 %v1445_v1 }
  0x1f   : > { %631 = vmatpush.msrb.mxu0 %v1464_v4  ;;  %1118 = vmatmul.msk.f32.vlgmr.msra.gmra.mxu2 %vm169_vm1, %v166_v32 }
  0x20   : > { %559 = vmatpush.msrb.mxu3 %v1445_v1  ;;  %424 = vmatpush.msrb.mxu1 %v1455_v3 }
  0x21   : > { %492 = vmatpush.msra.mxu2 %v1440_v0 }
  0x22   : > { %560 = vmatpush.msrb.mxu3 %v1455_v3  ;;  %425 = vmatpush.msrb.mxu1 %v1464_v4 }
  0x23   : > { %493 = vmatpush.msra.mxu2 %v1445_v1 }
  0x24   : > { %561 = vmatpush.msrb.mxu3 %v1464_v4  ;;  %698 = vmatpush.msra.mxu1 %v1440_v0 }
  0x25   : > { %494 = vmatpush.msra.mxu2 %v1455_v3 }
  0x26   : > { %699 = vmatpush.msra.mxu1 %v1445_v1 }
  0x27   : > { %495 = vmatpush.msra.mxu2 %v1464_v4 }
  0x28   : > { %700 = vmatpush.msra.mxu1 %v1455_v3 }
  0x2a   : > { %701 = vmatpush.msra.mxu1 %v1464_v4 }
  0x97   : > { %v197_v8 = vpop.f32.mrf.mxu0 }
  0x98   : > { %v224_v9 = vpop.f32.mrf.mxu1  ;;  %v1503_v10 = vadd.f32 %v1500_v7, %v197_v8 }
  0x9a   : > { %v227_v11 = vadd.f32 %v224_v9, %v1503_v10 }
  0x9c   : > { %1223 = vtanh.f32 %v227_v11  ;;  %v1119_v13 = vmul.f32 -1.442695, %v227_v11 }
  0x9e   : > { %1225 = vpow2.f32 %v1119_v13 }
  0xa2   : > { %v1224_v12 = vpop.eup %1223  ;;  %v1517_v36 = vpop.f32.mrf.mxu2 }
  0xa3   : > { %250 = vrot.lane.b32.xlu0 %v1224_v12, %s1366_s16 }
  0xa4   : > { %v1226_v14 = vpop.eup %1225 }
  0xa5   : > { %v231_v15 = vadd.f32 1.0, %v1226_v14 }
  0xa7   : > { %1227 = vrcp.f32 %v231_v15  ;;  %v243_v21 = vand.u32 2147483648, %v231_v15  ;;  %vm237_vm3 = vweird.f32 %v231_v15  ;;  %v241_v22 = vand.u32 2147483647, %v231_v15 }
  0xa9   : > { %v244_v24 = vor.u32 1.1754944e-38, %v243_v21  ;;  %vm242_vm5 = vcmp.eq.f32.partialorder %v241_v22, 8.507059e+37 }
  0xad   : > { %v1228_v16 = vpop.eup %1227 }
  0xae   : > { %v233_v17 = vmul.f32 %v1228_v16, %v231_v15  ;;  %vm238_vm2 = vweird.f32 %v1228_v16 }
  0xaf   : > { %vm239_vm4 = vmor %vm237_vm3, %vm238_vm2 }
  0xb0   : > { %v234_v18 = vsub.f32 1.0, %v233_v17 }
  0xb2   : > { %v235_v19 = vmul.f32 %v1228_v16, %v234_v18 }
  0xb4   : > { %v236_v20 = vadd.f32 %v1228_v16, %v235_v19 }
  0xb6   : > { %v240_v23 = vsel %vm239_vm4, %v1228_v16, %v236_v20 }
  0xb7   : > { %v245_v26 = vsel %vm242_vm5, %v244_v24, %v240_v23 }
  0xb8   : > { %v248_v28 = vmul.f32 0.0, %v245_v26 }
 0x115   : > { %v251_v25 = vpop.permute.xlu0 %250 }
 0x116   : > { %v253_v27 = vmul.f32 %v251_v25, %v245_v26 }
 0x118   : > { %255 = vrot.lane.b32.xlu0 %v253_v27, %s1366_s16 }
 0x18a   : > { %v256_v29 = vpop.permute.xlu0 %255 }
 0x18b   : > { %v258_v30 = vadd.f32 %v256_v29, %v248_v28 }
 0x18d   : > { %1229 = vtanh.f32 %v258_v30  ;;  %v315_v56 = vrot.slane %v258_v30, 6 }
 0x193   : > { %v1230_v31 = vpop.eup %1229 }
 0x194   : > { %261 = vrot.lane.b32.xlu1 %v1230_v31, %s1366_s16 }
 0x206   : > { %v262_v33 = vpop.permute.xlu1 %261 }
 0x207   : > { %v264_v34 = vmul.f32 %v262_v33, %v245_v26 }
 0x209   : > { %266 = vrot.lane.b32.xlu1 %v264_v34, %s1367_s17 }
 0x27b   : > { %v267_v35 = vpop.permute.xlu1 %266 }
 0x27c   : > { %1120 = vmatmul.msk.f32.vlgmr.msrb.gmra.mxu2 %vm203_vm6, %v267_v35 }
 0x2ff   : > { %v287_v37 = vpop.f32.mrf.mxu2 }
 0x300   : > { %v291_v38 = vrot.slane %v287_v37, 6 }
 0x302   : > { %v293_v39 = vadd.f32 %v291_v38, %v1503_v10 }
 0x304   : > { %1231 = vtanh.f32 %v293_v39  ;;  %v1121_v41 = vmul.f32 -1.442695, %v293_v39 }
 0x306   : > { %1233 = vpow2.f32 %v1121_v41 }
 0x30a   : > { %v1232_v40 = vpop.eup %1231 }
 0x30b   : > { %319 = vrot.lane.b32.xlu2 %v1232_v40, %s1366_s16 }
 0x30c   : > { %v1234_v42 = vpop.eup %1233 }
 0x30d   : > { %v297_v43 = vadd.f32 1.0, %v1234_v42 }
 0x30f   : > { %1235 = vrcp.f32 %v297_v43  ;;  %v309_v49 = vand.u32 2147483648, %v297_v43  ;;  %vm303_vm8 = vweird.f32 %v297_v43  ;;  %v307_v50 = vand.u32 2147483647, %v297_v43 }
 0x311   : > { %v310_v52 = vor.u32 1.1754944e-38, %v309_v49  ;;  %vm308_vm10 = vcmp.eq.f32.partialorder %v307_v50, 8.507059e+37 }
 0x315   : > { %v1236_v44 = vpop.eup %1235 }
 0x316   : > { %v299_v45 = vmul.f32 %v1236_v44, %v297_v43  ;;  %vm304_vm7 = vweird.f32 %v1236_v44 }
 0x317   : > { %vm305_vm9 = vmor %vm303_vm8, %vm304_vm7 }
 0x318   : > { %v300_v46 = vsub.f32 1.0, %v299_v45 }
 0x31a   : > { %v301_v47 = vmul.f32 %v1236_v44, %v300_v46 }
 0x31c   : > { %v302_v48 = vadd.f32 %v1236_v44, %v301_v47 }
 0x31e   : > { %v306_v51 = vsel %vm305_vm9, %v1236_v44, %v302_v48 }
 0x31f   : > { %v311_v54 = vsel %vm308_vm10, %v310_v52, %v306_v51 }
 0x320   : > { %v317_v57 = vmul.f32 %v315_v56, %v311_v54 }
 0x365   : > { %v320_v53 = vpop.permute.xlu2 %319 }
 0x366   : > { %v322_v55 = vmul.f32 %v320_v53, %v311_v54 }
 0x368   : > { %324 = vrot.lane.b32.xlu2 %v322_v55, %s1366_s16 }
 0x3c2   : > { %v325_v58 = vpop.permute.xlu2 %324 }
 0x3c3   : > { %v327_v59 = vadd.f32 %v325_v58, %v317_v57 }
 0x3c5   : > { %1237 = vtanh.f32 %v327_v59  ;;  %v385_v22 = vrot.slane %v327_v59, 6  ;;  %v1539_v59 = vadd.f32 %v1500_v7, %v1517_v36 }
 0x3cb   : > { %v1238_v60 = vpop.eup %1237 }
 0x3cc   : > { %330 = vrot.lane.b32.xlu0 %v1238_v60, %s1366_s16 }
 0x43e   : > { %v331_v61 = vpop.permute.xlu0 %330 }
 0x43f   : > { %v333_v62 = vmul.f32 %v331_v61, %v311_v54 }
 0x441   : > { %v335_v63 = vrot.slane %v333_v62, 2 }
 0x443   : > { %336 = vrot.lane.b32.xlu1 %v335_v63, %s1367_s17 }
 0x4b5   : > { %v337_v0 = vpop.permute.xlu1 %336 }
 0x4b6   : > { %1122 = vmatmul.msk.f32.vlgmr.msra.gmra.mxu3 %vm203_vm6, %v337_v0 }
 0x539   : > { %v357_v1 = vpop.f32.mrf.mxu3 }
 0x53a   : > { %v361_v2 = vrot.slane %v357_v1, 4 }
 0x53c   : > { %v363_v3 = vadd.f32 %v361_v2, %v1503_v10 }
 0x53e   : > { %1239 = vtanh.f32 %v363_v3  ;;  %v1123_v5 = vmul.f32 -1.442695, %v363_v3 }
 0x540   : > { %1241 = vpow2.f32 %v1123_v5 }
 0x544   : > { %v1240_v4 = vpop.eup %1239 }
 0x545   : > { %389 = vrot.lane.b32.xlu2 %v1240_v4, %s1366_s16 }
 0x546   : > { %v1242_v6 = vpop.eup %1241 }
 0x547   : > { %v367_v8 = vadd.f32 1.0, %v1242_v6 }
 0x549   : > { %1243 = vrcp.f32 %v367_v8  ;;  %v379_v15 = vand.u32 2147483648, %v367_v8  ;;  %vm373_vm12 = vweird.f32 %v367_v8  ;;  %v377_v16 = vand.u32 2147483647, %v367_v8 }
 0x54b   : > { %v380_v18 = vor.u32 1.1754944e-38, %v379_v15  ;;  %vm378_vm14 = vcmp.eq.f32.partialorder %v377_v16, 8.507059e+37 }
 0x54f   : > { %v1244_v9 = vpop.eup %1243 }
 0x550   : > { %v369_v11 = vmul.f32 %v1244_v9, %v367_v8  ;;  %vm374_vm11 = vweird.f32 %v1244_v9 }
 0x551   : > { %vm375_vm13 = vmor %vm373_vm12, %vm374_vm11 }
 0x552   : > { %v370_v12 = vsub.f32 1.0, %v369_v11 }
 0x554   : > { %v371_v13 = vmul.f32 %v1244_v9, %v370_v12 }
 0x556   : > { %v372_v14 = vadd.f32 %v1244_v9, %v371_v13 }
 0x558   : > { %v376_v17 = vsel %vm375_vm13, %v1244_v9, %v372_v14 }
 0x559   : > { %v381_v20 = vsel %vm378_vm14, %v380_v18, %v376_v17 }
 0x55a   : > { %v387_v23 = vmul.f32 %v385_v22, %v381_v20 }
 0x59f   : > { %v390_v19 = vpop.permute.xlu2 %389 }
 0x5a0   : > { %v392_v21 = vmul.f32 %v390_v19, %v381_v20 }
 0x5a2   : > { %394 = vrot.lane.b32.xlu0 %v392_v21, %s1366_s16 }
 0x614   : > { %v395_v24 = vpop.permute.xlu0 %394 }
 0x615   : > { %v397_v25 = vadd.f32 %v395_v24, %v387_v23 }
 0x617   : > { %1245 = vtanh.f32 %v397_v25  ;;  %v455_v50 = vrot.slane %v397_v25, 6 }
 0x61d   : > { %v1246_v26 = vpop.eup %1245 }
 0x61e   : > { %400 = vrot.lane.b32.xlu1 %v1246_v26, %s1366_s16 }
 0x690   : > { %v401_v27 = vpop.permute.xlu1 %400 }
 0x691   : > { %v403_v28 = vmul.f32 %v401_v27, %v381_v20 }
 0x693   : > { %v405_v29 = vrot.slane %v403_v28, 4 }
 0x695   : > { %406 = vrot.lane.b32.xlu2 %v405_v29, %s1367_s17 }
 0x6ef   : > { %v407_v30 = vpop.permute.xlu2 %406 }
 0x6f0   : > { %1124 = vmatmul.msk.f32.vlgmr.msrb.gmra.mxu1 %vm203_vm6, %v407_v30 }
 0x76d   : > { %v427_v31 = vpop.f32.mrf.mxu1 }
 0x76e   : > { %v431_v32 = vrot.slane %v427_v31, 2 }
 0x770   : > { %v433_v33 = vadd.f32 %v431_v32, %v1503_v10 }
 0x772   : > { %1247 = vtanh.f32 %v433_v33  ;;  %v1125_v35 = vmul.f32 -1.442695, %v433_v33 }
 0x774   : > { %1249 = vpow2.f32 %v1125_v35 }
 0x778   : > { %v1248_v34 = vpop.eup %1247 }
 0x779   : > { %459 = vrot.lane.b32.xlu0 %v1248_v34, %s1366_s16 }
 0x77a   : > { %v1250_v37 = vpop.eup %1249 }
 0x77b   : > { %v437_v38 = vadd.f32 1.0, %v1250_v37 }
 0x77d   : > { %1251 = vrcp.f32 %v437_v38  ;;  %v449_v44 = vand.u32 2147483648, %v437_v38  ;;  %vm443_vm0 = vweird.f32 %v437_v38  ;;  %v447_v45 = vand.u32 2147483647, %v437_v38 }
 0x77f   : > { %v450_v46 = vor.u32 1.1754944e-38, %v449_v44  ;;  %vm448_vm3 = vcmp.eq.f32.partialorder %v447_v45, 8.507059e+37 }
 0x783   : > { %v1252_v39 = vpop.eup %1251 }
 0x784   : > { %v439_v40 = vmul.f32 %v1252_v39, %v437_v38  ;;  %vm444_vm15 = vweird.f32 %v1252_v39 }
 0x785   : > { %vm445_vm2 = vmor %vm443_vm0, %vm444_vm15 }
 0x786   : > { %v440_v41 = vsub.f32 1.0, %v439_v40 }
 0x788   : > { %v441_v42 = vmul.f32 %v1252_v39, %v440_v41 }
 0x78a   : > { %v442_v43 = vadd.f32 %v1252_v39, %v441_v42 }
 0x78c   : > { %v446_v10 = vsel %vm445_vm2, %v1252_v39, %v442_v43 }
 0x78d   : > { %v451_v48 = vsel %vm448_vm3, %v450_v46, %v446_v10 }
 0x78e   : > { %v457_v51 = vmul.f32 %v455_v50, %v451_v48 }
 0x7eb   : > { %v460_v47 = vpop.permute.xlu0 %459 }
 0x7ec   : > { %v462_v49 = vmul.f32 %v460_v47, %v451_v48 }
 0x7ee   : > { %464 = vrot.lane.b32.xlu1 %v462_v49, %s1366_s16 }
 0x860   : > { %v465_v52 = vpop.permute.xlu1 %464 }
 0x861   : > { %v467_v53 = vadd.f32 %v465_v52, %v457_v51 }
 0x863   : > { %1253 = vtanh.f32 %v467_v53  ;;  %v522_v14 = vrot.slane %v467_v53, 6 }
 0x869   : > { %v1254_v54 = vpop.eup %1253 }
 0x86a   : > { %470 = vrot.lane.b32.xlu2 %v1254_v54, %s1366_s16 }
 0x8c4   : > { %v471_v55 = vpop.permute.xlu2 %470 }
 0x8c5   : > { %v473_v56 = vmul.f32 %v471_v55, %v451_v48 }
 0x8c7   : > { %v475_v57 = vrot.slane %v473_v56, 6 }
 0x8c9   : > { %476 = vrot.lane.b32.xlu0 %v475_v57, %s1367_s17 }
 0x93b   : > { %v477_v58 = vpop.permute.xlu0 %476 }
 0x93c   : > { %1126 = vmatmul.msk.f32.vlgmr.msra.gmra.mxu2 %vm203_vm6, %v477_v58 }
 0x9bf   : > { %v497_v60 = vpop.f32.mrf.mxu2 }
 0x9c0   : > { %v500_v61 = vadd.f32 %v497_v60, %v1539_v59 }
 0x9c2   : > { %1255 = vtanh.f32 %v500_v61  ;;  %v1127_v63 = vmul.f32 -1.442695, %v500_v61 }
 0x9c4   : > { %1257 = vpow2.f32 %v1127_v63 }
 0x9c8   : > { %v1256_v62 = vpop.eup %1255 }
 0x9c9   : > { %526 = vrot.lane.b32.xlu1 %v1256_v62, %s1366_s16 }
 0x9ca   : > { %v1258_v0 = vpop.eup %1257 }
 0x9cb   : > { %v504_v1 = vadd.f32 1.0, %v1258_v0 }
 0x9cd   : > { %1259 = vrcp.f32 %v504_v1  ;;  %v516_v7 = vand.u32 2147483648, %v504_v1  ;;  %vm510_vm5 = vweird.f32 %v504_v1  ;;  %v514_v36 = vand.u32 2147483647, %v504_v1 }
 0x9cf   : > { %v517_v9 = vor.u32 1.1754944e-38, %v516_v7  ;;  %vm515_vm8 = vcmp.eq.f32.partialorder %v514_v36, 8.507059e+37 }
 0x9d3   : > { %v1260_v2 = vpop.eup %1259 }
 0x9d4   : > { %v506_v3 = vmul.f32 %v1260_v2, %v504_v1  ;;  %vm511_vm4 = vweird.f32 %v1260_v2 }
 0x9d5   : > { %vm512_vm7 = vmor %vm510_vm5, %vm511_vm4 }
 0x9d6   : > { %v507_v4 = vsub.f32 1.0, %v506_v3 }
 0x9d8   : > { %v508_v5 = vmul.f32 %v1260_v2, %v507_v4 }
 0x9da   : > { %v509_v6 = vadd.f32 %v1260_v2, %v508_v5 }
 0x9dc   : > { %v513_v8 = vsel %vm512_vm7, %v1260_v2, %v509_v6  ;;  %vm879_vm7 = vcmask 785408  }
 0x9dd   : > { %v518_v12 = vsel %vm515_vm8, %v517_v9, %v513_v8 }
 0x9de   : > { %v524_v15 = vmul.f32 %v522_v14, %v518_v12 }
 0xa3b   : > { %v527_v11 = vpop.permute.xlu1 %526 }
 0xa3c   : > { %v529_v13 = vmul.f32 %v527_v11, %v518_v12 }
 0xa3e   : > { %531 = vrot.lane.b32.xlu2 %v529_v13, %s1366_s16 }
 0xa98   : > { %v532_v16 = vpop.permute.xlu2 %531 }
 0xa99   : > { %v534_v17 = vadd.f32 %v532_v16, %v524_v15 }
 0xa9b   : > { %1261 = vtanh.f32 %v534_v17  ;;  %v591_v42 = vrot.slane %v534_v17, 6 }
 0xaa1   : > { %v1262_v18 = vpop.eup %1261 }
 0xaa2   : > { %537 = vrot.lane.b32.xlu0 %v1262_v18, %s1366_s16 }
 0xb14   : > { %v538_v19 = vpop.permute.xlu0 %537 }
 0xb15   : > { %v540_v20 = vmul.f32 %v538_v19, %v518_v12 }
 0xb17   : > { %542 = vrot.lane.b32.xlu1 %v540_v20, %s1367_s17 }
 0xb89   : > { %v543_v21 = vpop.permute.xlu1 %542 }
 0xb8a   : > { %1128 = vmatmul.msk.f32.vlgmr.msrb.gmra.mxu3 %vm203_vm6, %v543_v21 }
 0xc0d   : > { %v563_v22 = vpop.f32.mrf.mxu3 }
 0xc0e   : > { %v567_v23 = vrot.slane %v563_v22, 6 }
 0xc10   : > { %v569_v24 = vadd.f32 %v567_v23, %v1539_v59 }
 0xc12   : > { %1263 = vtanh.f32 %v569_v24  ;;  %v1129_v26 = vmul.f32 -1.442695, %v569_v24 }
 0xc14   : > { %1265 = vpow2.f32 %v1129_v26 }
 0xc18   : > { %v1264_v25 = vpop.eup %1263 }
 0xc19   : > { %595 = vrot.lane.b32.xlu2 %v1264_v25, %s1366_s16 }
 0xc1a   : > { %v1266_v27 = vpop.eup %1265 }
 0xc1b   : > { %v573_v28 = vadd.f32 1.0, %v1266_v27 }
 0xc1d   : > { %1267 = vrcp.f32 %v573_v28  ;;  %v585_v34 = vand.u32 2147483648, %v573_v28  ;;  %vm579_vm10 = vweird.f32 %v573_v28  ;;  %v583_v35 = vand.u32 2147483647, %v573_v28 }
 0xc1f   : > { %v586_v38 = vor.u32 1.1754944e-38, %v585_v34  ;;  %vm584_vm12 = vcmp.eq.f32.partialorder %v583_v35, 8.507059e+37 }
 0xc23   : > { %v1268_v29 = vpop.eup %1267 }
 0xc24   : > { %v575_v30 = vmul.f32 %v1268_v29, %v573_v28  ;;  %vm580_vm9 = vweird.f32 %v1268_v29 }
 0xc25   : > { %vm581_vm11 = vmor %vm579_vm10, %vm580_vm9 }
 0xc26   : > { %v576_v31 = vsub.f32 1.0, %v575_v30 }
 0xc28   : > { %v577_v32 = vmul.f32 %v1268_v29, %v576_v31 }
 0xc2a   : > { %v578_v33 = vadd.f32 %v1268_v29, %v577_v32 }
 0xc2c   : > { %v582_v37 = vsel %vm581_vm11, %v1268_v29, %v578_v33 }
 0xc2d   : > { %v587_v40 = vsel %vm584_vm12, %v586_v38, %v582_v37 }
 0xc2e   : > { %v593_v43 = vmul.f32 %v591_v42, %v587_v40  ;;  %v1368_v42 = vmov 0  }
 0xc2f   : > { %1217 = vset.pattern.permute.xlu0 %v1368_v42 }
 0xc73   : > { %v596_v39 = vpop.permute.xlu2 %595 }
 0xc74   : > { %v598_v41 = vmul.f32 %v596_v39, %v587_v40  ;;  %v160_v39 = vld [vmem:[%s1670_s1 + $0x70] sm:$0xff] }
 0xc76   : > { %600 = vrot.lane.b32.xlu0 %v598_v41, %s1366_s16 }
 0xce8   : > { %v601_v44 = vpop.permute.xlu0 %600 }
 0xce9   : > { %v603_v45 = vadd.f32 %v601_v44, %v593_v43  ;;  %v155_v43 = vld [vmem:[%s1670_s1 + $0x48] sm:$0xff]  ;;  %v154_v44 = vld [vmem:[%s1670_s1 + $0x40] sm:$0xff] }
 0xcea   : > { %769 = vmatpush.msrb.mxu2 %v155_v43 }
 0xceb   : > { %1269 = vtanh.f32 %v603_v45  ;;  %v661_v6 = vrot.slane %v603_v45, 6  ;;  %v153_v45 = vld [vmem:[%s1670_s1 + $0x38] sm:$0xff] }
 0xcec   : > { %770 = vmatpush.msrb.mxu2 %v154_v44 }
 0xcee   : > { %771 = vmatpush.msrb.mxu2 %v153_v45 }
 0xcf1   : > { %v1270_v10 = vpop.eup %1269 }
 0xcf2   : > { %606 = vrot.lane.b32.xlu1 %v1270_v10, %s1366_s16  ;;  %v152_v10 = vld [vmem:[%s1670_s1 + $0x30] sm:$0xff] }
 0xcf3   : > { %772 = vmatpush.msrb.mxu2 %v152_v10 }
 0xd64   : > { %v607_v46 = vpop.permute.xlu1 %606 }
 0xd65   : > { %v609_v47 = vmul.f32 %v607_v46, %v587_v40  ;;  %v161_v40 = vld [vmem:[%s1670_s1 + $0x78] sm:$0xff]  ;;  %v1583_v46 = vld [vmem:[%s1473_s7 + $0x10] sm:$0xff]  ;;  %s1371_s7 = smov 127  }
 0xd66   : > { %v1202_v41 = vpack.i.bf16 %v160_v39, %v161_v40 }
 0xd67   : > { %v611_v48 = vrot.slane %v609_v47, 2 }
 0xd69   : > { %612 = vrot.lane.b32.xlu2 %v611_v48, %s1367_s17 }
 0xdc3   : > { %v613_v49 = vpop.permute.xlu2 %612 }
 0xdc4   : > { %1130 = vmatmul.msk.f32.vlgmr.msrb.gmra.mxu0 %vm203_vm6, %v613_v49 }
 0xe41   : > { %v633_v50 = vpop.f32.mrf.mxu0 }
 0xe42   : > { %v637_v51 = vrot.slane %v633_v50, 4  ;;  %v158_v50 = vld [vmem:[%s1670_s1 + $0x60] sm:$0xff] }
 0xe44   : > { %v639_v52 = vadd.f32 %v637_v51, %v1539_v59  ;;  %v159_v51 = vld [vmem:[%s1670_s1 + $0x68] sm:$0xff] }
 0xe46   : > { %1271 = vtanh.f32 %v639_v52  ;;  %v1131_v54 = vmul.f32 -1.442695, %v639_v52  ;;  %v1207_v52 = vpack.i.bf16 %v158_v50, %v159_v51 }
 0xe48   : > { %1273 = vpow2.f32 %v1131_v54  ;;  %v162_v54 = vld [vmem:[%s1670_s1 + $0x80] sm:$0xff] }
 0xe4c   : > { %v1272_v53 = vpop.eup %1271 }
 0xe4d   : > { %665 = vrot.lane.b32.xlu0 %v1272_v53, %s1366_s16  ;;  %v163_v53 = vld [vmem:[%s1670_s1 + $0x88] sm:$0xff] }
 0xe4e   : > { %v1274_v55 = vpop.eup %1273  ;;  %804 = vmatpush.msra.mxu3 %v163_v53 }
 0xe4f   : > { %v643_v56 = vadd.f32 1.0, %v1274_v55 }
 0xe50   : > { %805 = vmatpush.msra.mxu3 %v162_v54 }
 0xe51   : > { %1275 = vrcp.f32 %v643_v56  ;;  %v655_v63 = vand.u32 2147483648, %v643_v56  ;;  %vm649_vm14 = vweird.f32 %v643_v56  ;;  %v653_v0 = vand.u32 2147483647, %v643_v56 }
 0xe52   : > { %806 = vmatpush.msra.mxu3 %v161_v40 }
 0xe53   : > { %v656_v2 = vor.u32 1.1754944e-38, %v655_v63  ;;  %vm654_vm0 = vcmp.eq.f32.partialorder %v653_v0, 8.507059e+37  ;;  %v156_v63 = vld [vmem:[%s1670_s1 + $0x50] sm:$0xff] }
 0xe54   : > { %807 = vmatpush.msra.mxu3 %v160_v39 }
 0xe56   : > { %808 = vmatpush.msra.mxu3 %v159_v51 }
 0xe57   : > { %v1276_v57 = vpop.eup %1275 }
 0xe58   : > { %v645_v58 = vmul.f32 %v1276_v57, %v643_v56  ;;  %vm650_vm13 = vweird.f32 %v1276_v57  ;;  %v1197_v56 = vpack.i.bf16 %v162_v54, %v163_v53  ;;  %809 = vmatpush.msra.mxu3 %v158_v50 }
 0xe59   : > { %vm651_vm15 = vmor %vm649_vm14, %vm650_vm13 }
 0xe5a   : > { %v646_v60 = vsub.f32 1.0, %v645_v58 }
 0xe5c   : > { %v647_v61 = vmul.f32 %v1276_v57, %v646_v60 }
 0xe5e   : > { %v648_v62 = vadd.f32 %v1276_v57, %v647_v61 }
 0xe60   : > { %v652_v1 = vsel %vm651_vm15, %v1276_v57, %v648_v62  ;;  %v1219_v57 = vld [vmem:[%s1670_s1 + $0x2b] ss:$0 sm:$0xff]  ;;  %v157_v62 = vld [vmem:[%s1670_s1 + $0x58] sm:$0xff] }
 0xe61   : > { %v657_v4 = vsel %vm654_vm0, %v656_v2, %v652_v1  ;;  %810 = vmatpush.msra.mxu3 %v157_v62  ;;  %v1212_v0 = vpack.i.bf16 %v156_v63, %v157_v62 }
 0xe62   : > { %v663_v7 = vmul.f32 %v661_v6, %v657_v4 }
 0xe63   : > { %811 = vmatpush.msra.mxu3 %v156_v63 }
 0xebf   : > { %v666_v3 = vpop.permute.xlu0 %665 }
 0xec0   : > { %v668_v5 = vmul.f32 %v666_v3, %v657_v4 }
 0xec2   : > { %670 = vrot.lane.b32.xlu1 %v668_v5, %s1366_s16 }
 0xf34   : > { %v671_v36 = vpop.permute.xlu1 %670 }
 0xf35   : > { %v673_v8 = vadd.f32 %v671_v36, %v663_v7 }
 0xf37   : > { %1277 = vtanh.f32 %v673_v8  ;;  %v731_v33 = vrot.slane %v673_v8, 6  ;;  %v1220_v8 = vld [vmem:[%s1670_s1 + $0x29] ss:$0 sm:$0xff] }
 0xf3d   : > { %v1278_v9 = vpop.eup %1277 }
 0xf3e   : > { %676 = vrot.lane.b32.xlu2 %v1278_v9, %s1366_s16 }
 0xf98   : > { %v677_v11 = vpop.permute.xlu2 %676 }
 0xf99   : > { %v679_v12 = vmul.f32 %v677_v11, %v657_v4 }
 0xf9b   : > { %v681_v13 = vrot.slane %v679_v12, 4 }
 0xf9d   : > { %682 = vrot.lane.b32.xlu0 %v681_v13, %s1367_s17  ;;  %v1221_v13 = vld [vmem:[%s1670_s1 + $0x2a] ss:$0 sm:$0xff] }
0x100f   : > { %v683_v14 = vpop.permute.xlu0 %682 }
0x1010   : > { %1132 = vmatmul.msk.f32.vlgmr.msra.gmra.mxu1 %vm203_vm6, %v683_v14 }
0x108d   : > { %v703_v15 = vpop.f32.mrf.mxu1 }
0x108e   : > { %v707_v16 = vrot.slane %v703_v15, 2 }
0x1090   : > { %v709_v17 = vadd.f32 %v707_v16, %v1539_v59 }
0x1092   : > { %1279 = vtanh.f32 %v709_v17  ;;  %v1133_v19 = vmul.f32 -1.442695, %v709_v17  ;;  %v164_v17 = vld [vmem:[%s1670_s1 + $0x90] sm:$0xf] }
0x1093   : > { %1137 = vmatpush.xpose.msk.msrb.mxu1 %vm879_vm7, %v164_v17 }
0x1094   : > { %1281 = vpow2.f32 %v1133_v19 }
0x1098   : > { %v1280_v18 = vpop.eup %1279 }
0x1099   : > { %735 = vrot.lane.b32.xlu1 %v1280_v18, %s1366_s16 }
0x109a   : > { %v1282_v20 = vpop.eup %1281 }
0x109b   : > { %v713_v21 = vadd.f32 1.0, %v1282_v20 }
0x109d   : > { %1283 = vrcp.f32 %v713_v21  ;;  %v725_v27 = vand.u32 2147483648, %v713_v21  ;;  %vm719_vm3 = vweird.f32 %v713_v21  ;;  %v723_v28 = vand.u32 2147483647, %v713_v21 }
0x109f   : > { %v726_v29 = vor.u32 1.1754944e-38, %v725_v27  ;;  %vm724_vm5 = vcmp.eq.f32.partialorder %v723_v28, 8.507059e+37 }
0x10a3   : > { %v1284_v22 = vpop.eup %1283 }
0x10a4   : > { %v715_v23 = vmul.f32 %v1284_v22, %v713_v21  ;;  %vm720_vm2 = vweird.f32 %v1284_v22  ;;  %v945_v21 = vperm.slane %v1583_v46, 2 }
0x10a5   : > { %vm721_vm4 = vmor %vm719_vm3, %vm720_vm2  ;;  %vm1020_vm3 = vcmask 7168  }
0x10a6   : > { %v716_v24 = vsub.f32 1.0, %v715_v23 }
0x10a8   : > { %v717_v25 = vmul.f32 %v1284_v22, %v716_v24 }
0x10aa   : > { %v718_v26 = vadd.f32 %v1284_v22, %v717_v25 }
0x10ac   : > { %v722_v59 = vsel %vm721_vm4, %v1284_v22, %v718_v26  ;;  %vm1022_vm4 = vcmask 15360  }
0x10ad   : > { %v727_v31 = vsel %vm724_vm5, %v726_v29, %v722_v59  ;;  %v1222_v29 = vld [vmem:[%s1670_s1 + $0x2c] ss:$0 sm:$0xff]  ;;  %vm1025_vm5 = vcmask 31744  }
0x10ae   : > { %v733_v34 = vmul.f32 %v731_v33, %v727_v31 }
0x110b   : > { %v736_v30 = vpop.permute.xlu1 %735 }
0x110c   : > { %v738_v32 = vmul.f32 %v736_v30, %v727_v31 }
0x110e   : > { %740 = vrot.lane.b32.xlu2 %v738_v32, %s1366_s16 }
0x1116   : > { %1198 = vrot.lane.b32.xlu2 %v1197_v56, %s1367_s17 }
0x111e   : > { %1213 = vrot.lane.b32.xlu2 %v1212_v0, %s1367_s17 }
0x1126   : > { %850 = vrot.lane.b32.xlu2 %v1221_v13, %s1367_s17 }
0x112e   : > { %958 = vrot.lane.b32.xlu2 %v945_v21, %s1370_s8 }
0x1168   : > { %v741_v35 = vpop.permute.xlu2 %740 }
0x1169   : > { %v743_v37 = vadd.f32 %v741_v35, %v733_v34 }
0x116b   : > { %1285 = vtanh.f32 %v743_v37 }
0x1170   : > { %v1199_v1 = vpop.permute.xlu2 %1198 }
0x1171   : > { %v1286_v38 = vpop.eup %1285  ;;  %v1201_v2 = vunpack.i.h.bf16 %v1199_v1  ;;  %v1200_v3 = vunpack.i.l.bf16 %v1199_v1 }
0x1172   : > { %746 = vrot.lane.b32.xlu0 %v1286_v38, %s1366_s16 }
0x1173   : > { %864 = vmatpush.msra.mxu0 %v1200_v3 }
0x1175   : > { %865 = vmatpush.msra.mxu0 %v1201_v2 }
0x1178   : > { %v1214_v14 = vpop.permute.xlu2 %1213 }
0x1179   : > { %v1216_v15 = vunpack.i.h.bf16 %v1214_v14  ;;  %v1215_v16 = vunpack.i.l.bf16 %v1214_v14 }
0x117a   : > { %1203 = vrot.lane.b32.xlu0 %v1202_v41, %s1367_s17 }
0x1180   : > { %v851_v23 = vpop.permute.xlu2 %850 }
0x1182   : > { %780 = vperm.xlu0 %1217, %v1583_v46  }
0x1188   : > { %v959_v63 = vpop.permute.xlu2 %958 }
0x11e4   : > { %v747_v47 = vpop.permute.xlu0 %746 }
0x11e5   : > { %v749_v48 = vmul.f32 %v747_v47, %v727_v31 }
0x11e7   : > { %v752_v49 = vrot.slane %v749_v48, 6 }
0x11e9   : > { %753 = vrot.lane.b32.xlu1 %v752_v49, %s1367_s17 }
0x11ec   : > { %v1204_v55 = vpop.permute.xlu0 %1203 }
0x11ed   : > { %v1205_v4 = vunpack.i.l.bf16 %v1204_v55  ;;  %v1206_v5 = vunpack.i.h.bf16 %v1204_v55 }
0x11ef   : > { %866 = vmatpush.msra.mxu0 %v1205_v4 }
0x11f1   : > { %1208 = vrot.lane.b32.xlu1 %v1207_v52, %s1367_s17  ;;  %867 = vmatpush.msra.mxu0 %v1206_v5 }
0x11f4   : > { %v781_v58 = vpop.permute.xlu0 %780 }
0x11f5   : > { %v784_v60 = vmul.f32 %v1219_v57, %v781_v58 }
0x11f9   : > { %786 = vrot.lane.b32.xlu1 %v784_v60, %s1367_s17  ;;  %s1369_s17 = smov 1  }
0x1201   : > { %947 = vrot.lane.b32.xlu1 %v945_v21, %s1369_s17 }
0x125b   : > { %v754_v61 = vpop.permute.xlu1 %753 }
0x125c   : > { %1134 = vmatmul.msk.f32.vlgmr.msrb.gmra.mxu2 %vm203_vm6, %v754_v61  ;;  %vm792_vm6 = vcmask 523264  }
0x1263   : > { %v1209_v6 = vpop.permute.xlu1 %1208 }
0x1264   : > { %v1210_v7 = vunpack.i.l.bf16 %v1209_v6  ;;  %v1211_v36 = vunpack.i.h.bf16 %v1209_v6 }
0x1266   : > { %868 = vmatpush.msra.mxu0 %v1210_v7 }
0x1268   : > { %869 = vmatpush.msra.mxu0 %v1211_v36 }
0x126a   : > { %870 = vmatpush.msra.mxu0 %v1215_v16 }
0x126b   : > { %v787_v22 = vpop.permute.xlu1 %786 }
0x126c   : > { %871 = vmatpush.msra.mxu0 %v1216_v15 }
0x1273   : > { %v948_v54 = vpop.permute.xlu1 %947 }
0x12df   : > { %v774_v9 = vpop.f32.mrf.mxu2 }
0x12e0   : > { %v775_v11 = vadd.f32 %v1220_v8, %v774_v9 }
0x12e2   : > { %v777_v12 = vmax.f32 %v775_v11, 0.0  ;;  %v789_v24 = vadd.f32 %v787_v22, %v775_v11 }
0x12e4   : > { %1135 = vmatmul.msk.f32.vlgmr.msra.gmra.mxu3 %vm792_vm6, %v777_v12  ;;  %v790_v27 = vmax.f32 %v789_v24, 0.0 }
0x1367   : > { %v813_v18 = vpop.f32.mrf.mxu3 }
0x1368   : > { %v814_v19 = vadd.f32 %v1221_v13, %v813_v18 }
0x136a   : > { %v816_v20 = vmax.f32 %v814_v19, 0.0 }
0x136c   : > { %1136 = vmatmul.msk.f32.vlgmr.msra.gmra.mxu0 %vm792_vm6, %v816_v20 }
0x13e9   : > { %v873_v25 = vpop.f32.mrf.mxu0 }
0x13ea   : > { %v874_v26 = vadd.f32 %v873_v25, %v851_v23 }
0x13ec   : > { %v876_v28 = vmax.f32 %v874_v26, 0.0 }
0x13ee   : > { %v877_v59 = vsel %vm792_vm6, %v876_v28, %v790_v27  ;;  %vm1027_vm6 = vcmask 39936  }
0x13ef   : > { %1138 = vmatmul.msk.f32.vlgmr.msrb.gmra.mxu1 %vm879_vm7, %v877_v59  ;;  %vm1029_vm7 = vcmask 48128  }
0x146c   : > { %v903_v30 = vpop.f32.mrf.mxu1 }
0x146d   : > { %v904_v31 = vadd.f32 %v1222_v29, %v903_v30 }
0x146f   : > { %v907_v32 = vadd.f32 1e-05, %v904_v31 }
0x1471   : > { %v1139_v33 = vmul.f32 -1.442695, %v907_v32  ;;  %v930_v34 = vand.u32 2147483647, %v907_v32  ;;  %v927_v58 = vmax.f32 %v907_v32, 0.0  ;;  %vm928_vm13 = vcmp.ne.f32.partialorder %v907_v32, %v907_v32 }
0x1473   : > { %1287 = vpow2.f32 %v1139_v33  ;;  %v931_v35 = vsub.f32 0.0, %v930_v34 }
0x1475   : > { %v932_v37 = vmul.f32 1.442695, %v931_v35 }
0x1477   : > { %1289 = vpow2.f32 %v932_v37 }
0x1479   : > { %v1288_v38 = vpop.eup %1287 }
0x147a   : > { %v911_v39 = vadd.f32 1.0, %v1288_v38 }
0x147c   : > { %1291 = vrcp.f32 %v911_v39  ;;  %v923_v48 = vand.u32 2147483648, %v911_v39  ;;  %v921_v51 = vand.u32 2147483647, %v911_v39  ;;  %vm917_vm9 = vweird.f32 %v911_v39 }
0x147d   : > { %v1290_v40 = vpop.eup %1289 }
0x147e   : > { %v934_v41 = vadd.f32 1.0, %v1290_v40  ;;  %v937_v42 = vmul.f32 -0.5, %v1290_v40  ;;  %v940_v47 = vand.u32 2147483647, %v1290_v40  ;;  %v924_v55 = vor.u32 1.1754944e-38, %v923_v48 }
0x147f   : > { %vm922_vm12 = vcmp.eq.f32.partialorder %v921_v51, 8.507059e+37 }
0x1480   : > { %1293 = vlog2.f32 %v934_v41  ;;  %v938_v45 = vadd.f32 1.0, %v937_v42  ;;  %vm941_vm10 = vcmp.lt.f32.partialorder %v940_v47, 0.0004427343 }
0x1482   : > { %v1292_v43 = vpop.eup %1291  ;;  %v939_v52 = vmul.f32 %v1290_v40, %v938_v45 }
0x1483   : > { %v913_v44 = vmul.f32 %v1292_v43, %v911_v39  ;;  %vm918_vm8 = vweird.f32 %v1292_v43 }
0x1484   : > { %vm919_vm11 = vmor %vm917_vm9, %vm918_vm8  ;;  %vm1031_vm8 = vcmask 56320   ;;  %vm1033_vm9 = vcmask 58368  }
0x1485   : > { %v914_v10 = vsub.f32 1.0, %v913_v44 }
0x1486   : > { %v1294_v46 = vpop.eup %1293 }
0x1487   : > { %v936_v49 = vmul.f32 0.6931472, %v1294_v46  ;;  %v915_v50 = vmul.f32 %v1292_v43, %v914_v10 }
0x1489   : > { %v916_v53 = vadd.f32 %v1292_v43, %v915_v50  ;;  %v942_v56 = vsel %vm941_vm10, %v939_v52, %v936_v49 }
0x148a   : > { %v943_v62 = vadd.f32 %v942_v56, %v927_v58 }
0x148b   : > { %v920_v57 = vsel %vm919_vm11, %v1292_v43, %v916_v53 }
0x148c   : > { %v925_v60 = vsel %vm922_vm12, %v924_v55, %v920_v57  ;;  %v944_v0 = vsel %vm928_vm13, %v907_v32, %v943_v62 }
0x148d   : > { %v950_v61 = vmul.f32 %v948_v54, %v925_v60  ;;  %1295 = vrcp.f32 %v925_v60  ;;  %v961_v4 = vmul.f32 %v959_v63, %v944_v0  ;;  %v980_v7 = vand.u32 2147483648, %v925_v60 }
0x148e   : > { %1297 = vlog2.f32 %v925_v60  ;;  %v978_v8 = vand.u32 2147483647, %v925_v60  ;;  %vm974_vm15 = vweird.f32 %v925_v60 }
0x148f   : > { %952 = vrot.lane.b32.xlu0 %v950_v61, %s1371_s7  ;;  %1299 = vtanh.f32 %v904_v31  ;;  %v981_v11 = vor.u32 1.1754944e-38, %v980_v7 }
0x1490   : > { %vm979_vm2 = vcmp.eq.f32.partialorder %v978_v8, 8.507059e+37 }
0x1493   : > { %v1296_v1 = vpop.eup %1295 }
0x1494   : > { %v1298_v2 = vpop.eup %1297  ;;  %v970_v3 = vmul.f32 %v1296_v1, %v925_v60  ;;  %vm975_vm14 = vweird.f32 %v1296_v1 }
0x1495   : > { %v993_v5 = vmul.f32 0.6931472, %v1298_v2  ;;  %vm976_vm0 = vmor %vm974_vm15, %vm975_vm14  ;;  %v1300_v14 = vpop.eup %1299 }
0x1496   : > { %v971_v6 = vsub.f32 1.0, %v970_v3  ;;  %v1021_v31 = vsel %vm1020_vm3, %v1300_v14, %v925_v60 }
0x1497   : > { %995 = vrot.lane.b32.xlu2 %v993_v5, %s1371_s7  ;;  %963 = vrot.lane.b32.xlu0 %v961_v4, %s1371_s7 }
0x1498   : > { %v972_v36 = vmul.f32 %v1296_v1, %v971_v6 }
0x149a   : > { %v973_v9 = vadd.f32 %v1296_v1, %v972_v36 }
0x149c   : > { %v977_v12 = vsel %vm976_vm0, %v1296_v1, %v973_v9 }
0x149d   : > { %v982_v13 = vsel %vm979_vm2, %v981_v11, %v977_v12 }
0x149e   : > { %986 = vrot.lane.b32.xlu1 %v982_v13, %s1371_s7 }
0x149f   : > { %1009 = vrot.lane.b32.xlu0 %v1300_v14, %s1370_s8 }
0x14f1   : > { %v996_v24 = vpop.permute.xlu2 %995 }
0x1501   : > { %v953_v15 = vpop.permute.xlu0 %952 }
0x1502   : > { %v955_v16 = vadd.f32 %v1300_v14, %v953_v15 }
0x1504   : > { %v1140_v17 = vclamps-f32 %v955_v16, 1.0 }
0x1506   : > { %1001 = vrot.lane.b32.xlu1 %v1140_v17, %s1370_s8  ;;  %v983_v18 = vperm.slane %v1140_v17, 0 }
0x1508   : > { %v984_v19 = vsub.f32 %v983_v18, %v1300_v14 }
0x1509   : > { %v964_v27 = vpop.permute.xlu0 %963 }
0x150a   : > { %v966_v28 = vadd.f32 %v1300_v14, %v964_v27 }
0x150c   : > { %v1141_v59 = vclamps-f32 %v966_v28, 1.0 }
0x150e   : > { %1013 = vrot.lane.b32.xlu1 %v944_v0, %s1370_s8  ;;  %s1321_s8 = scalar_lea.hbm %s1671_s2, 16 }
0x150f   : > { %p1323_p1 = scmp.lt.s32.totalorder %s1321_s8, %s1317_s5 }
0x1510   : > { %v987_v20 = vpop.permute.xlu1 %986 }
0x1511   : > { %v989_v21 = vmul.f32 %v987_v20, %v984_v19  ;;  %v1010_v34 = vpop.permute.xlu0 %1009  ;;  %p1324_p2 = por %p1323_p1, %p1322_p0 }
0x1513   : > { %v990_v22 = vmul.f32 -0.5, %v989_v21  ;;  %p1325_p3 = pnand %p1324_p2, %p1320_p13 }
0x1515   : > { %v991_v23 = vmul.f32 %v990_v22, %v989_v21 }
0x1517   : > { %v998_v25 = vsub.f32 %v991_v23, %v996_v24 }
0x1519   : > { %v1142_v26 = vadd.f32 -0.9189385, %v998_v25 }
0x151b   : > { %1005 = vrot.lane.b32.xlu2 %v1142_v26, %s1372_s21 }
0x1523   : > { %1017 = vrot.lane.b32.xlu2 %v1141_v59, %s1373_s22 }
0x1575   : > { %v1006_v29 = vpop.permute.xlu2 %1005 }
0x1578   : > { %v1002_v30 = vpop.permute.xlu1 %1001 }
0x1579   : > { %v1023_v32 = vsel %vm1022_vm4, %v1021_v31, %v1002_v30 }
0x157a   : > { %v1024_v33 = vsel %vm169_vm1, %v1023_v32, %v1006_v29 }
0x157b   : > { %v1026_v37 = vsel %vm1025_vm5, %v1024_v33, %v1010_v34 }
0x157d   : > { %v1018_v38 = vpop.permute.xlu2 %1017 }
0x1580   : > { %v1014_v35 = vpop.permute.xlu1 %1013 }
0x1581   : > { %v1028_v39 = vsel %vm1027_vm6, %v1026_v37, %v1014_v35 }
0x1582   : > { %v1030_v40 = vsel %vm1029_vm7, %v1028_v39, %v1018_v38 }
0x1583   : > { %v1032_v41 = vsel %vm1031_vm8, %v1030_v40, 0.0 }
0x1584   : > { %1034 = vst.msk [vmem:[%s136_s29] sm:$0x3] %vm1033_vm9, %v1032_v41 }
0x1585   : > { %1328 = shalt.err (!%p1325_p3)
}
0x1586   : > { %1149 = dma.vmem_to_hbm [thread:$0]  (%p1427_p5), %s1049_s30, 32, %s1051_s3, %s1036_s13  }
0x1587 PF: > { %p1155_p4 = scmp.ge.s32.totalorder %s1363_s12, 2  ;;  %s1062_s7 = sand.u32 1, %s1351_s9  }
0x1588   : > { %s1063_s21 = scalar_lea.sflag [#allocation3], %s1062_s7 }
0x1589   : > { %p1152_p7 = pnand %p1155_p4, %p1431_p6 }
0x158b   : > { %p1153_p8 = pneg %p1152_p7 }
0x158d   : > { %1346 = dma.done.wait (%p1153_p8), %s1063_s21, 32  }
0x158e   : > { %1348 = vsyncadd (%p1153_p8), %s1063_s21, 4294967264  ;;  %p12_p9 = scmp.ge.s32.totalorder %s1414_s15, 10   ;;  %s1674_s9 = smov %s1355_s10 }
0x158f   : > { %s1675_s10 = smov %s1359_s11  ;;  %s1676_s11 = smov %s1425_s18 }
0x1590   : > { %s1677_s12 = smov %s1414_s15  ;;  %14 = sbr.rel (!%p12_p9) target bundleno = 3 (0x3), region = 63 }
0x1595   :  { %1069 = vsyncpa [#allocation3], 1 }
0x1596   :  { %1071 = vsyncpa [#allocation3 + $0x1], 1 }

</bundles_post_ra>
